<compile_context>
chip_gen: v6e
topology: v6e:2x2x1
jax: 0.10.0
libtpu: 0.0.40
codegen_flags: <defaults>
</compile_context>

<pallas_src>
import jax
import jax.numpy as jnp
from jax.experimental import pallas as pl
from jax.experimental.pallas import tpu as pltpu


def _round_up(a, b):
    return (a + b - 1) // b * b


def _vmem_limit_bytes():
    # Half the physical per-core VMEM as the scoped limit; safe on every
    # generation (v7x has 64 MiB per TensorCore).
    try:
        cap = pltpu.get_tpu_info().vmem_capacity_bytes
    except Exception:
        cap = 64 * 1024 * 1024
    return min(cap // 2, 64 * 1024 * 1024)


def _fold_projector(weight, bias, height, width):
    """Fold the 2*x/(W-1)-1 normalization into the Linear(2, F) projector.

    x_norm*W0 + y_norm*W1 + b == x*(2*W0/(W-1)) + y*(2*W1/(H-1)) + (b - W0 - W1)
    NOTE: width==1 or height==1 is degenerate (division by zero) in the PyTorch
    module as well; precondition height, width >= 2.
    """
    w32 = weight.astype(jnp.float32)
    b32 = bias.astype(jnp.float32)
    return jnp.stack(
        [(2.0 / (width - 1)) * w32[:, 0],
         (2.0 / (height - 1)) * w32[:, 1],
         b32 - w32[:, 0] - w32[:, 1]],
        axis=0)                                                   # (3, F)


# ---------------------------------------------------------------------------
# Kernel 1: standalone FourierEmbedding
# ---------------------------------------------------------------------------

def _fourier_kernel(xy_ref, w_ref, o_ref):
    # xy_ref: (tm, 2) f32   w_ref: (3, F) f32 = [w0_fold; w1_fold; b_fold]
    # o_ref : (tm, F)
    xy = xy_ref[...]
    val = (xy[:, 0:1] * w_ref[0:1, :]        # x * folded W[:, 0]   (VPU FMA)
           + xy[:, 1:2] * w_ref[1:2, :]      # y * folded W[:, 1]
           + w_ref[2:3, :])                  # folded bias
    o_ref[...] = jnp.sin(val).astype(o_ref.dtype)


def _pick_row_tile(n_rows, n_feat, itemsize, vmem_limit):
    # Count BOTH double-buffered tiles: the output (lanes pad to 128) and the
    # (tm, 2) xy tile, which also occupies a full 128-lane row per sublane.
    f_lanes = _round_up(n_feat, 128)
    bytes_per_row = 2 * f_lanes * itemsize + 2 * 128 * 4
    tm_cap = max(8, (vmem_limit // 2 // bytes_per_row) // 8 * 8)
    tm = min(1024, tm_cap, _round_up(n_rows, 8))
    # Keep the row-grid step count even when there is enough work so both v7x
    # TensorCores get balanced shares under "parallel" semantics.
    steps = pl.cdiv(n_rows, tm)
    if steps % 2 == 1 and n_rows > 8:
        tm = max(8, _round_up(pl.cdiv(n_rows, steps + 1), 8))
    return tm


def fourier_embedding(y, x, weight, bias, *, height, width,
                      out_dtype=jnp.float32, block_rows=None):
    """y, x: [B, N] pixel coords; weight: [F, 2]; bias: [F]. Returns [B, N, F].

    out_dtype=jnp.bfloat16 is recommended when the consumer runs in bf16
    (halves writeback bytes -- the binding resource on v5e).
    """
    B, N = y.shape
    F = weight.shape[0]
    M = B * N
    itemsize = jnp.dtype(out_dtype).itemsize
    vmem_limit = _vmem_limit_bytes()

    w_folded = _fold_projector(weight, bias, height, width)          # (3, F)
    # Pack x and y into one (M, 2) array -> a single small DMA per row tile.
    xy = jnp.stack([x.reshape(M).astype(jnp.float32),
                    y.reshape(M).astype(jnp.float32)], axis=1)

    tm = block_rows if block_rows is not None else _pick_row_tile(
        M, F, itemsize, vmem_limit)
    grid = (pl.cdiv(M, tm),)       # no row padding: Pallas masks the edge block

    out = pl.pallas_call(
        _fourier_kernel,
        out_shape=jax.ShapeDtypeStruct((M, F), out_dtype),           # no F padding
        grid_spec=pltpu.PrefetchScalarGridSpec(
            num_scalar_prefetch=0,
            grid=grid,
            in_specs=[
                pl.BlockSpec((tm, 2), lambda i: (i, 0)),   # packed (x, y)
                pl.BlockSpec((3, F), lambda i: (0, 0)),    # packed folded proj
            ],
            out_specs=pl.BlockSpec((tm, F), lambda i: (i, 0)),
        ),
        compiler_params=pltpu.CompilerParams(
            dimension_semantics=("parallel",),
            vmem_limit_bytes=vmem_limit,
        ),
    )(xy, w_folded)

    return out.reshape(B, N, F)    # pure reshape: no slice copy


# ---------------------------------------------------------------------------
# Kernel 2: fused ViTInput  (embed -> concat -> Linear, no HBM embed tensor)
# ---------------------------------------------------------------------------

def _vit_input_kernel(xy_ref, we_ref, x_ref, woe_ref, wox_ref, bo_ref, o_ref):
    # xy_ref : (tn, 2) f32            we_ref : (3, F_emb) folded projector
    # x_ref  : (1, tn, C_in)          woe_ref: (F_emb, feat)  wox_ref: (C_in, feat)
    # bo_ref : (1, feat)              o_ref  : (1, tn, feat)
    xy = xy_ref[...]
    arg = (xy[:, 0:1] * we_ref[0:1, :]
           + xy[:, 1:2] * we_ref[1:2, :]
           + we_ref[2:3, :])
    embed = jnp.sin(arg)                                   # (tn, F_emb), VMEM only
    # Embedding half of the concat-Linear on the MXU.
    acc = jnp.dot(embed, woe_ref[...], preferred_element_type=jnp.float32)
    # Image-channel half: K = C_in (image channels) is tiny -> VPU broadcast FMAs.
    xv = x_ref[0].astype(jnp.float32)                      # (tn, C_in)
    for c in range(xv.shape[-1]):
        acc = acc + xv[:, c:c + 1] * wox_ref[c:c + 1, :]
    o_ref[0] = (acc + bo_ref[...]).astype(o_ref.dtype)


def vit_input(x_tokens, emb_weight, emb_bias, out_weight, out_bias, *,
              height, width, out_dtype=jnp.float32, block_rows=None):
    """Fused ViTInput.forward.

    x_tokens:   [B, N, C_in] with N = height*width   (itokens of PixelwiseViT)
    emb_weight: [F_emb, 2], emb_bias: [F_emb]         (FourierEmbedding.projector)
    out_weight: [features, F_emb + C_in], out_bias: [features]  (ViTInput.output)
    Returns [B, N, features].
    """
    B, N, C_in = x_tokens.shape
    F_emb = emb_weight.shape[0]
    features = out_weight.shape[0]
    assert N == height * width
    assert out_weight.shape[1] == F_emb + C_in

    # Constant coordinate grid exactly as ViTInput builds it
    # (torch.meshgrid 'ij' on (width, height), flattened row-major).
    xg, yg = jnp.meshgrid(jnp.arange(width, dtype=jnp.float32),
                          jnp.arange(height, dtype=jnp.float32), indexing="ij")
    xy = jnp.stack([xg.reshape(-1), yg.reshape(-1)], axis=1)          # (N, 2)

    we = _fold_projector(emb_weight, emb_bias, height, width)         # (3, F_emb)
    # Split the concat-Linear weight: out = embed @ Woe + x_tok @ Wox + b.
    wo32 = out_weight.astype(jnp.float32)
    woe = wo32[:, :F_emb].T                                            # (F_emb, feat)
    wox = wo32[:, F_emb:].T                                            # (C_in, feat)
    bo = out_bias.astype(jnp.float32).reshape(1, features)

    tn = block_rows if block_rows is not None else min(512, _round_up(N, 8))
    grid = (B, pl.cdiv(N, tn))

    return pl.pallas_call(
        _vit_input_kernel,
        out_shape=jax.ShapeDtypeStruct((B, N, features), out_dtype),
        grid_spec=pltpu.PrefetchScalarGridSpec(
            num_scalar_prefetch=0,
            grid=grid,
            in_specs=[
                pl.BlockSpec((tn, 2), lambda b, n: (n, 0)),
                pl.BlockSpec((3, F_emb), lambda b, n: (0, 0)),
                pl.BlockSpec((1, tn, C_in), lambda b, n: (b, n, 0)),
                pl.BlockSpec((F_emb, features), lambda b, n: (0, 0)),
                pl.BlockSpec((C_in, features), lambda b, n: (0, 0)),
                pl.BlockSpec((1, features), lambda b, n: (0, 0)),
            ],
            out_specs=pl.BlockSpec((1, tn, features), lambda b, n: (b, n, 0)),
        ),
        compiler_params=pltpu.CompilerParams(
            dimension_semantics=("parallel", "parallel"),
            vmem_limit_bytes=_vmem_limit_bytes(),
        ),
    )(xy, we, x_tokens, woe, wox, bo)


if __name__ == "__main__":
    key = jax.random.PRNGKey(0)
    k_img, k_ew, k_eb, k_ow, k_ob, k_x2, k_y2 = jax.random.split(key, 7)

    # Shapes consistent with PixelwiseViT: image_shape=(4, 16, 16),
    # embed_features=32, features=64, batch=2.
    B, C, H, W = 2, 4, 16, 16
    N = H * W
    F_emb, features = 32, 64

    be = 1.0 / jnp.sqrt(2.0)                       # nn.Linear(2, F_emb) init
    emb_w = jax.random.uniform(k_ew, (F_emb, 2), jnp.float32, -be, be)
    emb_b = jax.random.uniform(k_eb, (F_emb,), jnp.float32, -be, be)
    bo_ = 1.0 / jnp.sqrt(F_emb + C)                # nn.Linear(F_emb + C, features)
    out_w = jax.random.uniform(k_ow, (features, F_emb + C), jnp.float32, -bo_, bo_)
    out_b = jax.random.uniform(k_ob, (features,), jnp.float32, -bo_, bo_)

    img = jax.random.normal(k_img, (B, C, H, W), jnp.float32)
    itokens = img.reshape(B, C, N).transpose(0, 2, 1)          # [B, N, C]

    # Coordinate grid exactly as ViTInput builds it.
    xg, yg = jnp.meshgrid(jnp.arange(W, dtype=jnp.float32),
                          jnp.arange(H, dtype=jnp.float32), indexing="ij")
    xc = xg.reshape(1, -1)
    yc = yg.reshape(1, -1)

    def embed_ref(y_, x_):
        x_n = 2 * x_ / (W - 1) - 1
        y_n = 2 * y_ / (H - 1) - 1
        z = jnp.stack([x_n, y_n], axis=2)                      # [B, N, 2]
        return jnp.sin(z @ emb_w.T + emb_b)                    # [B, N, F_emb]

    # 1) Standalone FourierEmbedding kernel, module-exact check (f32).
    emb = jax.block_until_ready(
        fourier_embedding(yc, xc, emb_w, emb_b, height=H, width=W))
    assert emb.shape == (1, N, F_emb)
    assert jnp.allclose(emb, embed_ref(yc, xc), atol=1e-5, rtol=1e-5), \
        "fourier_embedding mismatch"

    # 2) Ragged row count (exercises the masked edge block -- no padding path
    #    anymore) + bf16 output (halves writeback on v5e).
    B2, N2 = 2, 50
    y2 = jax.random.uniform(k_y2, (B2, N2), jnp.float32, 0.0, H - 1)
    x2 = jax.random.uniform(k_x2, (B2, N2), jnp.float32, 0.0, W - 1)
    emb2 = jax.block_until_ready(
        fourier_embedding(y2, x2, emb_w, emb_b, height=H, width=W,
                          out_dtype=jnp.bfloat16))
    assert emb2.shape == (B2, N2, F_emb)
    assert jnp.allclose(emb2.astype(jnp.float32), embed_ref(y2, x2),
                        atol=2e-2, rtol=2e-2), "fourier_embedding bf16 mismatch"

    # 3) Fused ViTInput kernel (embedding never written to HBM).
    y_fused = jax.block_until_ready(
        vit_input(itokens, emb_w, emb_b, out_w, out_b,
                  height=H, width=W, block_rows=128))
    emb_full = jnp.broadcast_to(embed_ref(yc, xc), (B, N, F_emb))
    vit_ref = jnp.concatenate([emb_full, itokens], axis=2) @ out_w.T + out_b
    assert y_fused.shape == (B, N, features)
    # MXU f32 matmul pass structure differs from the XLA reference dot;
    # values are O(0.3), numerical error is O(1e-3).
    assert jnp.allclose(y_fused, vit_ref, atol=2e-2, rtol=2e-2), \
        "vit_input mismatch"

    print("KERNEL_OK")
</pallas_src>

<mosaic_0001>
module attributes {stable_mosaic.version = 11 : i64} {
  func.func @_fourier_kernel(%arg0: i32, %arg1: memref<128x2xf32, #tpu.memory_space<vmem>>, %arg2: memref<3x32xf32, #tpu.memory_space<vmem>>, %arg3: memref<128x32xf32, #tpu.memory_space<vmem>>) attributes {dimension_semantics = [#tpu.dimension_semantics<parallel>], iteration_bounds = array<i64: 2>, scalar_prefetch = 0 : i64, scratch_operands = 0 : i64, tpu.core_type = #tpu.core_type<tc>, window_params = [{transform_indices = @transform_0, window_bounds = array<i64: 128, 2>}, {pipeline_mode = #tpu.pipeline_mode<synchronous>, transform_indices = @transform_1, window_bounds = array<i64: 3, 32>}, {transform_indices = @transform_2, window_bounds = array<i64: 128, 32>}]} {
    %c0 = arith.constant 0 : index
    %c0_0 = arith.constant 0 : index
    %0 = vector.load %arg1[%c0, %c0_0] : memref<128x2xf32, #tpu.memory_space<vmem>>, vector<128x2xf32>
    %1 = vector.extract_strided_slice %0 {offsets = [0, 0], sizes = [128, 1], strides = [1, 1]} : vector<128x2xf32> to vector<128x1xf32>
    %c0_1 = arith.constant 0 : index
    %c0_2 = arith.constant 0 : index
    %2 = vector.load %arg2[%c0_1, %c0_2] : memref<3x32xf32, #tpu.memory_space<vmem>>, vector<1x32xf32>
    %3 = vector.broadcast %1 : vector<128x1xf32> to vector<128x32xf32>
    %4 = vector.broadcast %2 : vector<1x32xf32> to vector<128x32xf32>
    %5 = arith.mulf %3, %4 : vector<128x32xf32>
    %6 = vector.extract_strided_slice %0 {offsets = [0, 1], sizes = [128, 1], strides = [1, 1]} : vector<128x2xf32> to vector<128x1xf32>
    %c1 = arith.constant 1 : index
    %c0_3 = arith.constant 0 : index
    %7 = vector.load %arg2[%c1, %c0_3] : memref<3x32xf32, #tpu.memory_space<vmem>>, vector<1x32xf32>
    %8 = vector.broadcast %6 : vector<128x1xf32> to vector<128x32xf32>
    %9 = vector.broadcast %7 : vector<1x32xf32> to vector<128x32xf32>
    %10 = arith.mulf %8, %9 : vector<128x32xf32>
    %11 = arith.addf %5, %10 : vector<128x32xf32>
    %c2 = arith.constant 2 : index
    %c0_4 = arith.constant 0 : index
    %12 = vector.load %arg2[%c2, %c0_4] : memref<3x32xf32, #tpu.memory_space<vmem>>, vector<1x32xf32>
    %13 = vector.broadcast %12 : vector<1x32xf32> to vector<128x32xf32>
    %14 = arith.addf %11, %13 : vector<128x32xf32>
    %15 = math.sin %14 : vector<128x32xf32>
    %c0_5 = arith.constant 0 : index
    %c0_6 = arith.constant 0 : index
    %16 = vector.load %arg3[%c0_5, %c0_6] : memref<128x32xf32, #tpu.memory_space<vmem>>, vector<128x32xf32>
    tpu.vector_store %arg3[%c0_5, %c0_6], %15 {strides = array<i32>} : memref<128x32xf32, #tpu.memory_space<vmem>>, vector<128x32xf32>,
    return
  }
  func.func @transform_0(%arg0: i32) -> (i32, i32) {
    %c0_i32 = arith.constant 0 : i32
    %c0_i32_0 = arith.constant 0 : i32
    return %arg0, %c0_i32 : i32, i32
  }
  func.func @transform_1(%arg0: i32) -> (i32, i32) {
    %c0_i32 = arith.constant 0 : i32
    %c0_i32_0 = arith.constant 0 : i32
    %c0_i32_1 = arith.constant 0 : i32
    return %c0_i32, %c0_i32_0 : i32, i32
  }
  func.func @transform_2(%arg0: i32) -> (i32, i32) {
    %c0_i32 = arith.constant 0 : i32
    %c0_i32_0 = arith.constant 0 : i32
    return %arg0, %c0_i32 : i32, i32
  }
}

</mosaic_0001>

<bundles_post_ra>
// kernel: tpu_custom_call.1
= control target key start
LH: loop header
LB: loop body
LE: loop exit
PB: predicated region body
PF: predicated region fallthrough
CT: control target
= control target key end

     0   :  { %s2384_s9 = smov 0   ;;  %s3778_s0 = inlined_call_operand.vmem [shape: f32[256,2], index: 0, kind: input, shape index: {}]   ;;  %s3779_s1 = inlined_call_operand.vmem [shape: f32[3,32], index: 1, kind: input, shape index: {}]   ;;  %s3780_s2 = inlined_call_operand.vmem [shape: f32[256,32], index: 2, kind: output, shape index: {}]  }
   0x1 LB: > { %s2123_s10 = sadd.s32 4294967295, %s2359_s9   ;;  %p2127_p0 = scmp.ge.s32.totalorder %s2359_s9, 1  ;;  %s2359_s9 = sphi %s2384_s9, %s12_s9  }
   0x2   : > { %p113_p1 = scmp.lt.s32.totalorder %s2359_s9, 3 }
   0x4   : > { %p114_p2 = pnand %p2127_p0, %p113_p1 }
   0x5   : > { %s2128_s11 = sshll.u32 (!%p114_p2), %s2123_s10, 4 }
   0x6   : > { %117 = sbr.rel (%p114_p2) target bundleno = 621 (0x26d), region = 28  ;;  %p136_p3 = scmp.lt.s32.totalorder (!%p114_p2), %s2128_s11, 31 }
   0xb   : > { %v2361_v0 = vmov 0   ;;  %s3810_s11 = smov (!%p136_p3, %s2128_s11), 31  ;;  %v2362_v17 = vmov 1   ;;  %v2132_v22 = vld [vmem:[%s3779_s1] ss:$0 sm:$0xff] }
   0xc   : > { %2282 = vset.pattern.permute.xlu1 %v2361_v0  ;;  %2281 = vset.pattern.permute.xlu0 %v2361_v0  ;;  %s2129_s12 = sshll.u32 %s3810_s11, 3  ;;  %v2430_v47 = vld [vmem:[%s3779_s1 + $0x1] ss:$0 sm:$0xff]  ;;  %v2437_v54 = vld [vmem:[%s3779_s1 + $0x2] ss:$0 sm:$0xff] }
   0xd   : > { %s139_s15 = scalar_lea.vmem %s3778_s0, %s2129_s12  ;;  %s2707_s24 = scalar_lea.vmem %s3780_s2, %s2129_s12 }
   0xe   : > { %v149_v1 = vld [vmem:[%s139_s15 + $0x10] sm:$0xff]  ;;  %v147_v2 = vld [vmem:[%s139_s15] sm:$0xff]  ;;  %v150_v3 = vld [vmem:[%s139_s15 + $0x18] sm:$0xff] }
   0xf   : > { %176 = vperm.xlu1 %2282, %v149_v1   ;;  %166 = vperm.xlu0 %2281, %v147_v2   ;;  %v148_v4 = vld [vmem:[%s139_s15 + $0x8] sm:$0xff]  ;;  %v151_v6 = vld [vmem:[%s139_s15 + $0x20] sm:$0xff]  ;;  %v154_v7 = vld [vmem:[%s139_s15 + $0x38] sm:$0xff] }
  0x10   : > { %v152_v5 = vld [vmem:[%s139_s15 + $0x28] sm:$0xff]  ;;  %v153_v8 = vld [vmem:[%s139_s15 + $0x30] sm:$0xff]  ;;  %v155_v10 = vld [vmem:[%s139_s15 + $0x40] sm:$0xff] }
  0x11   : > { %v156_v9 = vld [vmem:[%s139_s15 + $0x48] sm:$0xff]  ;;  %v158_v11 = vld [vmem:[%s139_s15 + $0x58] sm:$0xff]  ;;  %v157_v12 = vld [vmem:[%s139_s15 + $0x50] sm:$0xff] }
  0x12   : > { %v160_v13 = vld [vmem:[%s139_s15 + $0x68] sm:$0xff]  ;;  %v159_v14 = vld [vmem:[%s139_s15 + $0x60] sm:$0xff]  ;;  %v162_v15 = vld [vmem:[%s139_s15 + $0x78] sm:$0xff] }
  0x13   : > { %181 = vperm.xlu1 %2282, %v150_v3   ;;  %171 = vperm.xlu0 %2281, %v148_v4   ;;  %v161_v16 = vld [vmem:[%s139_s15 + $0x70] sm:$0xff] }
  0x17   : > { %191 = vperm.xlu1 %2282, %v152_v5   ;;  %186 = vperm.xlu0 %2281, %v151_v6  }
  0x1b   : > { %201 = vperm.xlu1 %2282, %v154_v7   ;;  %196 = vperm.xlu0 %2281, %v153_v8  }
  0x1f   : > { %211 = vperm.xlu1 %2282, %v156_v9   ;;  %206 = vperm.xlu0 %2281, %v155_v10  }
  0x23   : > { %221 = vperm.xlu1 %2282, %v158_v11   ;;  %216 = vperm.xlu0 %2281, %v157_v12  }
  0x27   : > { %231 = vperm.xlu1 %2282, %v160_v13   ;;  %226 = vperm.xlu0 %2281, %v159_v14  }
  0x2b   : > { %241 = vperm.xlu1 %2282, %v162_v15   ;;  %236 = vperm.xlu0 %2281, %v161_v16  }
  0x2f   : > { %2284 = vset.pattern.permute.xlu1 %v2362_v17  ;;  %2283 = vset.pattern.permute.xlu0 %v2362_v17 }
  0x30   : > { %270 = vperm.xlu1 %2284, %v148_v4   ;;  %266 = vperm.xlu0 %2283, %v147_v2  }
  0x34   : > { %274 = vperm.xlu1 %2284, %v149_v1   ;;  %278 = vperm.xlu0 %2283, %v150_v3  }
  0x38   : > { %282 = vperm.xlu1 %2284, %v151_v6   ;;  %286 = vperm.xlu0 %2283, %v152_v5  }
  0x3c   : > { %290 = vperm.xlu1 %2284, %v153_v8   ;;  %294 = vperm.xlu0 %2283, %v154_v7  }
  0x40   : > { %298 = vperm.xlu1 %2284, %v155_v10   ;;  %302 = vperm.xlu0 %2283, %v156_v9  }
  0x44   : > { %306 = vperm.xlu1 %2284, %v157_v12   ;;  %310 = vperm.xlu0 %2283, %v158_v11  }
  0x48   : > { %314 = vperm.xlu1 %2284, %v159_v14   ;;  %318 = vperm.xlu0 %2283, %v160_v13  }
  0x4c   : > { %322 = vperm.xlu1 %2284, %v161_v16   ;;  %326 = vperm.xlu0 %2283, %v162_v15  }
  0x8a   : > { %v177_v18 = vpop.permute.xlu1 %176  ;;  %v167_v19 = vpop.permute.xlu0 %166 }
  0x8b   : > { %v248_v50 = vmul.f32 %v2132_v22, %v167_v19  ;;  %v250_v61 = vmul.f32 %v2132_v22, %v177_v18 }
  0x8e   : > { %v182_v20 = vpop.permute.xlu1 %181  ;;  %v172_v21 = vpop.permute.xlu0 %171 }
  0x8f   : > { %v249_v51 = vmul.f32 %v2132_v22, %v172_v21  ;;  %v251_v17 = vmul.f32 %v2132_v22, %v182_v20 }
  0x92   : > { %v192_v23 = vpop.permute.xlu1 %191  ;;  %v187_v24 = vpop.permute.xlu0 %186 }
  0x93   : > { %v2403_v25 = vmul.f32 %v2132_v22, %v192_v23  ;;  %v2405_v26 = vmul.f32 %v2132_v22, %v187_v24 }
  0x96   : > { %v202_v27 = vpop.permute.xlu1 %201  ;;  %v197_v28 = vpop.permute.xlu0 %196 }
  0x97   : > { %v2407_v29 = vmul.f32 %v2132_v22, %v202_v27  ;;  %v2409_v30 = vmul.f32 %v2132_v22, %v197_v28 }
  0x9a   : > { %v212_v31 = vpop.permute.xlu1 %211  ;;  %v207_v32 = vpop.permute.xlu0 %206 }
  0x9b   : > { %v2411_v33 = vmul.f32 %v2132_v22, %v212_v31  ;;  %v2413_v34 = vmul.f32 %v2132_v22, %v207_v32 }
  0x9e   : > { %v222_v35 = vpop.permute.xlu1 %221  ;;  %v217_v36 = vpop.permute.xlu0 %216 }
  0x9f   : > { %v2415_v37 = vmul.f32 %v2132_v22, %v222_v35  ;;  %v2417_v38 = vmul.f32 %v2132_v22, %v217_v36 }
  0xa2   : > { %v232_v39 = vpop.permute.xlu1 %231  ;;  %v227_v40 = vpop.permute.xlu0 %226 }
  0xa3   : > { %v2419_v41 = vmul.f32 %v2132_v22, %v232_v39  ;;  %v2421_v42 = vmul.f32 %v2132_v22, %v227_v40  ;;  %v2363_v39 = vmov 683565275  }
  0xa6   : > { %v242_v43 = vpop.permute.xlu1 %241  ;;  %v237_v44 = vpop.permute.xlu0 %236 }
  0xa7   : > { %v2423_v45 = vmul.f32 %v2132_v22, %v242_v43  ;;  %v2425_v46 = vmul.f32 %v2132_v22, %v237_v44  ;;  %v2364_v43 = vmov 2475754826  }
  0xab   : > { %v271_v48 = vpop.permute.xlu1 %270  ;;  %v267_v49 = vpop.permute.xlu0 %266 }
  0xac   : > { %v334_v52 = vmul.f32 %v2430_v47, %v271_v48  ;;  %v333_v53 = vmul.f32 %v2430_v47, %v267_v49  ;;  %v2365_v48 = vmov 2131351028  }
  0xae   : > { %v350_v55 = vadd.f32 %v334_v52, %v249_v51  ;;  %v349_v56 = vadd.f32 %v333_v53, %v248_v50  ;;  %v2366_v50 = vmov 2102212464   ;;  %v2367_v52 = vmov 920167782  }
  0xaf   : > { %v275_v57 = vpop.permute.xlu1 %274  ;;  %v279_v7 = vpop.permute.xlu0 %278 }
  0xb0   : > { %v2440_v58 = vadd.f32 %v2437_v54, %v350_v55  ;;  %v2443_v59 = vadd.f32 %v2437_v54, %v349_v56  ;;  %v335_v60 = vmul.f32 %v2430_v47, %v275_v57  ;;  %v336_v12 = vmul.f32 %v2430_v47, %v279_v7 }
  0xb2   : > { %v490_v62 = vand.u32 2147483647, %v2440_v58  ;;  %v493_v63 = vand.u32 2139095040, %v2440_v58  ;;  %v386_v0 = vand.u32 2147483647, %v2443_v59  ;;  %v389_v1 = vand.u32 2139095040, %v2443_v59 }
  0xb3   : > { %v351_v3 = vadd.f32 %v335_v60, %v250_v61  ;;  %v2459_v27 = vadd.f32 %v336_v12, %v251_v17  ;;  %vm492_vm13 = vcmp.lt.s32.totalorder %v2440_v58, 0  ;;  %vm388_vm14 = vcmp.lt.s32.totalorder %v2443_v59, 0 }
  0xb4   : > { %v494_v2 = vshrl.u32 %v493_v63, 23  ;;  %v497_v4 = vand.u32 8388607, %v490_v62  ;;  %v390_v5 = vshrl.u32 %v389_v1, 23  ;;  %v393_v6 = vand.u32 8388607, %v386_v0 }
  0xb5   : > { %v2455_v9 = vadd.f32 %v2437_v54, %v351_v3  ;;  %v2368_v63 = vmov 1326507024  }
  0xb6   : > { %v2139_v8 = vadd.s32 4294967169, %v494_v2  ;;  %v2135_v10 = vadd.s32 4294967169, %v390_v5  ;;  %v498_v13 = vor.u32 8388608, %v497_v4  ;;  %v394_v14 = vor.u32 8388608, %v393_v6 }
  0xb7   : > { %v597_v16 = vand.u32 2139095040, %v2455_v9  ;;  %v594_v35 = vand.u32 2147483647, %v2455_v9 }
  0xb8   : > { %v500_v11 = vadd.s32 1, %v2139_v8  ;;  %v396_v15 = vadd.s32 1, %v2135_v10  ;;  %v2461_v28 = vshll.u32 %v498_v13, 8  ;;  %v2465_v32 = vshll.u32 %v394_v14, 8 }
  0xb9   : > { %v598_v19 = vshrl.u32 %v597_v16, 23 }
  0xba   : > { %vm501_vm0 = vcmp.gt.s32.totalorder %v500_v11, 0  ;;  %vm397_vm1 = vcmp.gt.s32.totalorder %v396_v15, 0 }
  0xbb   : > { %v502_v18 = vsel %vm501_vm0, %v500_v11, 0  ;;  %v398_v24 = vsel %vm397_vm1, %v396_v15, 0  ;;  %v2469_v40 = vadd.s32 4294967169, %v598_v19  ;;  %vm2574_vm1 = vcmp.le.f32.partialorder %v490_v62, 0.7853982 }
  0xbc   : > { %v503_v21 = vshrl.u32 %v502_v18, 5  ;;  %v504_v23 = vand.u32 31, %v502_v18  ;;  %v2463_v31 = vshrl.u32 %v398_v24, 5  ;;  %v400_v22 = vand.u32 31, %v398_v24 }
  0xbe   : > { %v505_v36 = vsub.s32 32, %v504_v23  ;;  %v507_v20 = vshll.u32 %v2363_v39, %v504_v23  ;;  %v510_v44 = vshll.u32 %v2364_v43, %v504_v23  ;;  %v513_v49 = vshll.u32 %v2365_v48, %v504_v23 }
  0xbf   : > { %v516_v51 = vshll.u32 %v2366_v50, %v504_v23  ;;  %v519_v53 = vshll.u32 %v2367_v52, %v504_v23  ;;  %vm522_vm2 = vcmp.lt.s32.totalorder %v503_v21, 1  ;;  %vm523_vm3 = vcmp.lt.s32.totalorder %v503_v21, 2 }
  0xc0   : > { %v508_v55 = vshrl.u32 %v2364_v43, %v505_v36  ;;  %v511_v56 = vshrl.u32 %v2365_v48, %v505_v36  ;;  %v514_v57 = vshrl.u32 %v2366_v50, %v505_v36  ;;  %v506_v60 = vshrl.u32 %v2363_v39, %v505_v36 }
  0xc1   : > { %v517_v61 = vshrl.u32 %v2367_v52, %v505_v36  ;;  %v520_v1 = vshrl.u32 %v2368_v63, %v505_v36  ;;  %v401_v5 = vsub.s32 32, %v400_v22  ;;  %vm524_vm4 = vcmp.lt.s32.totalorder %v503_v21, 3 }
  0xc2   : > { %v509_v2 = vor.u32 %v508_v55, %v507_v20  ;;  %v512_v3 = vor.u32 %v511_v56, %v510_v44  ;;  %v515_v4 = vor.u32 %v514_v57, %v513_v49  ;;  %vm525_vm5 = vcmp.lt.s32.totalorder %v503_v21, 4 }
  0xc3   : > { %v518_v6 = vor.u32 %v517_v61, %v516_v51  ;;  %v521_v7 = vor.u32 %v520_v1, %v519_v53  ;;  %v403_v16 = vshll.u32 %v2363_v39, %v400_v22  ;;  %v404_v19 = vshrl.u32 %v2364_v43, %v401_v5 }
  0xc4   : > { %v526_v8 = vsel %vm522_vm2, %v506_v60, %v509_v2  ;;  %v527_v10 = vsel %vm525_vm5, %v515_v4, 2102212464  ;;  %v530_v11 = vsel %vm522_vm2, %v509_v2, %v512_v3  ;;  %v534_v12 = vsel %vm522_vm2, %v512_v3, %v515_v4 }
  0xc5   : > { %v528_v13 = vsel %vm524_vm4, %v512_v3, %v527_v10  ;;  %v531_v14 = vsel %vm525_vm5, %v518_v6, 920167782  ;;  %v535_v15 = vsel %vm525_vm5, %v521_v7, 1326507024  ;;  %v406_v23 = vshll.u32 %v2364_v43, %v400_v22 }
  0xc6   : > { %v532_v17 = vsel %vm524_vm4, %v515_v4, %v531_v14  ;;  %v536_v18 = vsel %vm524_vm4, %v518_v6, %v535_v15  ;;  %v529_v24 = vsel %vm523_vm3, %v526_v8, %v528_v13  ;;  %v407_v44 = vshrl.u32 %v2365_v48, %v401_v5 }
  0xc7   : > { %v533_v36 = vsel %vm523_vm3, %v530_v11, %v532_v17  ;;  %v537_v20 = vsel %vm523_vm3, %v534_v12, %v536_v18  ;;  %v405_v56 = vor.u32 %v404_v19, %v403_v16  ;;  %v409_v60 = vshll.u32 %v2365_v48, %v400_v22 }
  0xc8   : > { %v2492_v49 = vmul.u32.u64.low %v2461_v28, %v537_v20  ;;  %v2493_v51 = vmul.u32.u64.high %v2461_v28, %v537_v20, %v2492_v49  ;;  %v2496_v53 = vmul.u32.u64.low %v2461_v28, %v533_v36  ;;  %v2497_v55 = vmul.u32.u64.high %v2461_v28, %v533_v36, %v2496_v53 }
  0xc9   : > { %v408_v57 = vor.u32 %v407_v44, %v406_v23  ;;  %v410_v61 = vshrl.u32 %v2366_v50, %v401_v5  ;;  %v402_v1 = vshrl.u32 %v2363_v39, %v401_v5  ;;  %v412_v21 = vshll.u32 %v2366_v50, %v400_v22 }
  0xca   : > { %v413_v2 = vshrl.u32 %v2367_v52, %v401_v5  ;;  %v416_v3 = vshrl.u32 %v2368_v63, %v401_v5  ;;  %v545_v4 = vmul.u32 %v2461_v28, %v529_v24  ;;  %v415_v7 = vshll.u32 %v2367_v52, %v400_v22 }
  0xcb   : > { %v411_v6 = vor.u32 %v410_v61, %v409_v60  ;;  %vm418_vm6 = vcmp.lt.s32.totalorder %v2463_v31, 1  ;;  %vm547_vm7 = vc.u32 %v2493_v51, %v2496_v53  ;;  %v548_v8 = vadd.s32 1, %v2497_v55 }
  0xcc   : > { %v414_v10 = vor.u32 %v413_v2, %v412_v21  ;;  %vm419_vm8 = vcmp.lt.s32.totalorder %v2463_v31, 2  ;;  %v417_v11 = vor.u32 %v416_v3, %v415_v7  ;;  %vm420_vm9 = vcmp.lt.s32.totalorder %v2463_v31, 3 }
  0xcd   : > { %vm421_vm10 = vcmp.lt.s32.totalorder %v2463_v31, 4  ;;  %v426_v5 = vsel %vm418_vm6, %v405_v56, %v408_v57  ;;  %v549_v28 = vsel %vm547_vm7, %v548_v8, %v2497_v55  ;;  %v430_v22 = vsel %vm418_vm6, %v408_v57, %v411_v6 }
  0xce   : > { %v423_v12 = vsel %vm421_vm10, %v411_v6, 2102212464  ;;  %v427_v13 = vsel %vm421_vm10, %v414_v10, 920167782  ;;  %v550_v14 = vadd.s32 %v549_v28, %v545_v4  ;;  %v422_v15 = vsel %vm418_vm6, %v402_v1, %v405_v56 }
  0xcf   : > { %v428_v16 = vsel %vm420_vm9, %v411_v6, %v427_v13  ;;  %v431_v17 = vsel %vm421_vm10, %v417_v11, 1326507024  ;;  %v424_v18 = vsel %vm420_vm9, %v408_v57, %v423_v12  ;;  %v604_v24 = vadd.s32 1, %v2469_v40 }
  0xd0   : > { %v429_v19 = vsel %vm419_vm8, %v426_v5, %v428_v16  ;;  %v432_v23 = vsel %vm420_vm9, %v414_v10, %v431_v17  ;;  %v551_v36 = vadd.s32 536870912, %v550_v14  ;;  %v601_v57 = vand.u32 8388607, %v594_v35 }
  0xd1   : > { %v433_v20 = vsel %vm419_vm8, %v430_v22, %v432_v23  ;;  %v2520_v44 = vmul.u32.u64.low %v2465_v32, %v429_v19  ;;  %v2521_v49 = vmul.u32.u64.high %v2465_v32, %v429_v19, %v2520_v44  ;;  %vm605_vm11 = vcmp.gt.s32.totalorder %v604_v24, 0 }
  0xd2   : > { %v2525_v55 = vmul.u32.u64.low %v2465_v32, %v433_v20  ;;  %v2526_v56 = vmul.u32.u64.high %v2465_v32, %v433_v20, %v2525_v55  ;;  %v552_v60 = vshrl.u32 %v551_v36, 30  ;;  %v425_v40 = vsel %vm419_vm8, %v422_v15, %v424_v18 }
  0xd3   : > { %v606_v61 = vsel %vm605_vm11, %v604_v24, 0  ;;  %v444_v2 = vadd.s32 1, %v2521_v49  ;;  %v2535_v3 = vadd.f32 %v2437_v54, %v2459_v27  ;;  %v441_v4 = vmul.u32 %v2465_v32, %v425_v40 }
  0xd4   : > { %v608_v1 = vand.u32 31, %v606_v61  ;;  %v553_v21 = vshll.u32 %v552_v60, 30  ;;  %vm443_vm12 = vc.u32 %v2526_v56, %v2520_v44  ;;  %v602_v6 = vor.u32 8388608, %v601_v57 }
  0xd5   : > { %v445_v31 = vsel %vm443_vm12, %v444_v2, %v2521_v49  ;;  %v546_v11 = vadd.s32 %v2496_v53, %v2493_v51  ;;  %v698_v27 = vand.u32 2147483647, %v2535_v3  ;;  %v701_v13 = vand.u32 2139095040, %v2535_v3 }
  0xd6   : > { %v609_v7 = vsub.s32 32, %v608_v1  ;;  %v2540_v8 = vsub.s32 %v550_v14, %v553_v21  ;;  %v446_v10 = vadd.s32 %v445_v31, %v441_v4  ;;  %v2548_v12 = vshll.u32 %v602_v6, 8 }
  0xd7   : > { %v2552_v14 = vshrl.u32 %v606_v61, 5  ;;  %v576_v51 = vsub.s32 4, %v552_v60  ;;  %v611_v17 = vshll.u32 %v2363_v39, %v608_v1  ;;  %v614_v23 = vshll.u32 %v2364_v43, %v608_v1 }
  0xd8   : > { %v556_v5 = vsub.s32 0, %v2540_v8  ;;  %v447_v28 = vadd.s32 536870912, %v446_v10  ;;  %v612_v32 = vshrl.u32 %v2364_v43, %v609_v7  ;;  %v615_v15 = vshrl.u32 %v2365_v48, %v609_v7 }
  0xd9   : > { %v618_v16 = vshrl.u32 %v2366_v50, %v609_v7  ;;  %v621_v18 = vshrl.u32 %v2367_v52, %v609_v7  ;;  %v617_v24 = vshll.u32 %v2365_v48, %v608_v1  ;;  %v624_v36 = vshrl.u32 %v2368_v63, %v609_v7 }
  0xda   : > { %v2140_v22 = vmin.u32 %v556_v5, %v2540_v8  ;;  %v448_v53 = vshrl.u32 %v447_v28, 30  ;;  %v613_v49 = vor.u32 %v612_v32, %v611_v17  ;;  %v620_v55 = vshll.u32 %v2366_v50, %v608_v1 }
  0xdb   : > { %v702_v57 = vshrl.u32 %v701_v13, 23  ;;  %v616_v61 = vor.u32 %v615_v15, %v614_v23  ;;  %v619_v21 = vor.u32 %v618_v16, %v617_v24  ;;  %v623_v2 = vshll.u32 %v2367_v52, %v608_v1 }
  0xdc   : > { %v558_v19 = vclz %v2140_v22  ;;  %v449_v20 = vshll.u32 %v448_v53, 30  ;;  %v2565_v4 = vsel %vm492_vm13, %v576_v51, %v552_v60  ;;  %v610_v31 = vshrl.u32 %v2363_v39, %v609_v7 }
  0xdd   : > { %v622_v5 = vor.u32 %v621_v18, %v620_v55  ;;  %v472_v28 = vsub.s32 4, %v448_v53  ;;  %v625_v32 = vor.u32 %v624_v36, %v623_v2  ;;  %vm626_vm0 = vcmp.lt.s32.totalorder %v2552_v14, 1 }
  0xde   : > { %v2141_v40 = vadd.s32 4294967294, %v558_v19  ;;  %v2568_v6 = vsub.s32 %v446_v10, %v449_v20  ;;  %vm628_vm2 = vcmp.lt.s32.totalorder %v2552_v14, 3  ;;  %vm629_vm3 = vcmp.lt.s32.totalorder %v2552_v14, 4 }
  0xdf   : > { %vm2583_vm4 = vcmp.le.f32.partialorder %v386_v0, 0.7853982  ;;  %v631_v15 = vsel %vm629_vm3, %v619_v21, 2102212464  ;;  %v634_v62 = vsel %vm626_vm0, %v613_v49, %v616_v61  ;;  %v635_v17 = vsel %vm629_vm3, %v622_v5, 920167782 }
  0xe0   : > { %vm2142_vm15 = vcmp.lt.s32.totalorder %v2141_v40, 0  ;;  %v452_v13 = vsub.s32 0, %v2568_v6  ;;  %v638_v18 = vsel %vm626_vm0, %v616_v61, %v619_v21  ;;  %v636_v0 = vsel %vm628_vm2, %v619_v21, %v635_v17 }
  0xe1   : > { %v561_v60 = vsel %vm2142_vm15, 0, %v2141_v40  ;;  %v639_v24 = vsel %vm629_vm3, %v625_v32, 1326507024  ;;  %vm627_vm5 = vcmp.lt.s32.totalorder %v2552_v14, 2  ;;  %v630_v20 = vsel %vm626_vm0, %v610_v31, %v613_v49 }
  0xe2   : > { %v562_v7 = vsub.s32 32, %v561_v60  ;;  %v566_v10 = vsub.s32 4294967266, %v561_v60  ;;  %v563_v16 = vshll.u32 %v2540_v8, %v561_v60  ;;  %v2136_v51 = vmin.u32 %v452_v13, %v2568_v6 }
  0xe3   : > { %v632_v8 = vsel %vm628_vm2, %v616_v61, %v631_v15  ;;  %v637_v2 = vsel %vm627_vm5, %v634_v62, %v636_v0  ;;  %v442_v61 = vadd.s32 %v2520_v44, %v2526_v56  ;;  %vm2050_vm11 = vcmask 261120  }
  0xe4   : > { %v564_v19 = vshrl.u32 %v546_v11, %v562_v7  ;;  %v567_v23 = vadd.s32 127, %v566_v10  ;;  %v454_v36 = vclz %v2136_v51  ;;  %v640_v11 = vsel %vm628_vm2, %v622_v5, %v639_v24 }
  0xe5   : > { %v641_v13 = vsel %vm627_vm5, %v638_v18, %v640_v11  ;;  %v2603_v21 = vmul.u32.u64.low %v2548_v12, %v637_v2  ;;  %v2604_v32 = vmul.u32.u64.high %v2548_v12, %v637_v2, %v2603_v21  ;;  %v473_v10 = vsel %vm388_vm14, %v472_v28, %v448_v53 }
  0xe6   : > { %v565_v55 = vor.u32 %v564_v19, %v563_v16  ;;  %v568_v40 = vshll.u32 %v567_v23, 23  ;;  %v2137_v60 = vadd.s32 4294967294, %v454_v36  ;;  %v633_v14 = vsel %vm627_vm5, %v630_v20, %v632_v8  ;;  %v283_v8 = vpop.permute.xlu1 %282 }
  0xe7   : > { %v2609_v49 = vmul.u32.u64.low %v2548_v12, %v641_v13  ;;  %v2610_v31 = vmul.u32.u64.high %v2548_v12, %v641_v13, %v2609_v49  ;;  %v2147_v5 = vadd.s32 4294967169, %v702_v57  ;;  %v579_v16 = vsel %vm2574_vm1, 0, %v2565_v4 }
  0xe8   : > { %v569_v7 = vor.u32 4788187, %v568_v40  ;;  %vm2138_vm6 = vcmp.lt.s32.totalorder %v2137_v60, 0  ;;  %v572_v62 = vcvt.s32.f32 %v565_v55  ;;  %v475_v53 = vsel %vm2583_vm4, 0, %v473_v10  ;;  %v287_v55 = vpop.permute.xlu0 %286 }
  0xe9   : > { %v457_v51 = vsel %vm2138_vm6, 0, %v2137_v60  ;;  %v652_v28 = vadd.s32 1, %v2604_v32  ;;  %v649_v44 = vmul.u32 %v2548_v12, %v633_v14  ;;  %vm651_vm7 = vc.u32 %v2610_v31, %v2603_v21 }
  0xea   : > { %v570_v15 = vand.u32 2147483647, %v569_v7  ;;  %v458_v17 = vsub.s32 32, %v457_v51  ;;  %v462_v18 = vsub.s32 4294967266, %v457_v51  ;;  %v708_v56 = vadd.s32 1, %v2147_v5 }
  0xeb   : > { %v459_v57 = vshll.u32 %v2568_v6, %v457_v51  ;;  %v653_v4 = vsel %vm651_vm7, %v652_v28, %v2604_v32  ;;  %v705_v20 = vand.u32 8388607, %v698_v27  ;;  %v583_v40 = vadd.s32 3, %v579_v16 }
  0xec   : > { %v573_v19 = vmul.f32 %v572_v62, %v570_v15  ;;  %v460_v23 = vshrl.u32 %v442_v61, %v458_v17  ;;  %v463_v0 = vadd.s32 127, %v462_v18  ;;  %v654_v36 = vadd.s32 %v653_v4, %v649_v44 }
  0xed   : > { %vm709_vm8 = vcmp.gt.s32.totalorder %v708_v56, 0  ;;  %v479_v6 = vadd.s32 3, %v475_v53  ;;  %v337_v49 = vmul.f32 %v2430_v47, %v283_v8  ;;  %v338_v61 = vmul.f32 %v2430_v47, %v287_v55 }
  0xee   : > { %v574_v24 = vxor.u32 2147483648, %v573_v19  ;;  %v461_v2 = vor.u32 %v460_v23, %v459_v57  ;;  %v464_v12 = vshll.u32 %v463_v0, 23  ;;  %v710_v11 = vsel %vm709_vm8, %v708_v56, 0 }
  0xef   : > { %v655_v13 = vadd.s32 536870912, %v654_v36  ;;  %v712_v7 = vand.u32 31, %v710_v11  ;;  %v2635_v16 = vand.u32 3, %v583_v40  ;;  %v2637_v51 = vand.u32 3, %v479_v6 }
  0xf0   : > { %v575_v60 = vsel %vm492_vm13, %v574_v24, %v573_v19  ;;  %v465_v10 = vor.u32 4788187, %v464_v12  ;;  %v468_v62 = vcvt.s32.f32 %v461_v2  ;;  %v706_v1 = vor.u32 8388608, %v705_v20 }
  0xf1   : > { %v578_v32 = vsel %vm2574_vm1, %v2440_v58, %v575_v60  ;;  %v2633_v14 = vshrl.u32 %v655_v13, 30  ;;  %v713_v5 = vsub.s32 32, %v712_v7  ;;  %v2641_v53 = vadd.s32 %v2603_v21, %v2610_v31 }
  0xf2   : > { %2285 = vcosq.f32 %v578_v32  ;;  %v466_v15 = vand.u32 2147483647, %v465_v10  ;;  %v353_v28 = vadd.f32 %v337_v49, %v2405_v26  ;;  %v2645_v19 = vadd.f32 %v338_v61, %v2403_v25 }
  0xf3   : > { %2287 = vsinq.f32 %v578_v32  ;;  %v657_v17 = vshll.u32 %v2633_v14, 30  ;;  %v719_v56 = vshrl.u32 %v2365_v48, %v713_v5  ;;  %v722_v57 = vshrl.u32 %v2366_v50, %v713_v5 }
  0xf4   : > { %v469_v18 = vmul.f32 %v468_v62, %v466_v15  ;;  %v725_v23 = vshrl.u32 %v2367_v52, %v713_v5  ;;  %v2652_v4 = vshrl.u32 %v710_v11, 5  ;;  %v716_v24 = vshrl.u32 %v2364_v43, %v713_v5 }
  0xf5   : > { %v2647_v44 = vsub.s32 %v654_v36, %v657_v17  ;;  %v724_v21 = vshll.u32 %v2366_v50, %v712_v7  ;;  %v715_v25 = vshll.u32 %v2363_v39, %v712_v7  ;;  %v718_v31 = vshll.u32 %v2364_v43, %v712_v7 }
  0xf6   : > { %v470_v0 = vxor.u32 2147483648, %v469_v18  ;;  %v721_v36 = vshll.u32 %v2365_v48, %v712_v7  ;;  %vm589_vm9 = vcmp.eq.s32.totalorder %v2635_v16, 2  ;;  %v727_v55 = vshll.u32 %v2367_v52, %v712_v7 }
  0xf7   : > { %v660_v26 = vsub.s32 0, %v2647_v44  ;;  %v726_v8 = vor.u32 %v725_v23, %v724_v21  ;;  %v728_v40 = vshrl.u32 %v2368_v63, %v713_v5  ;;  %vm586_vm10 = vcmp.eq.s32.totalorder %v2635_v16, 0 }
  0xf8   : > { %v471_v20 = vsel %vm388_vm14, %v470_v0, %v469_v18  ;;  %v720_v11 = vor.u32 %v719_v56, %v718_v31  ;;  %v723_v60 = vor.u32 %v722_v57, %v721_v36  ;;  %vm585_vm12 = vcmp.lt.s32.totalorder %v2635_v16, 2 }
  0xf9   : > { %v474_v2 = vsel %vm2583_vm4, %v2443_v59, %v471_v20  ;;  %v2144_v12 = vmin.u32 %v660_v26, %v2647_v44  ;;  %v717_v6 = vor.u32 %v716_v24, %v715_v25  ;;  %v729_v13 = vor.u32 %v728_v40, %v727_v55 }
  0xfa   : > { %2289 = vcosq.f32 %v474_v2  ;;  %v2671_v32 = vshll.u32 %v706_v1, 8  ;;  %vm582_vm13 = vweird.f32 %v2440_v58  ;;  %vm733_vm14 = vcmp.lt.s32.totalorder %v2652_v4, 4 }
  0xfb   : > { %2291 = vsinq.f32 %v474_v2  ;;  %v662_v7 = vclz %v2144_v12  ;;  %v2676_v22 = vadd.f32 %v2437_v54, %v353_v28  ;;  %vm596_vm15 = vcmp.lt.s32.totalorder %v2455_v9, 0 }
  0xfc   : > { %v680_v10 = vsub.s32 4, %v2633_v14  ;;  %v714_v49 = vshrl.u32 %v2363_v39, %v713_v5  ;;  %vm730_vm0 = vcmp.lt.s32.totalorder %v2652_v4, 1  ;;  %v739_v61 = vsel %vm733_vm14, %v726_v8, 920167782 }
  0xfd   : > { %v2145_v15 = vadd.s32 4294967294, %v662_v7  ;;  %vm732_vm1 = vcmp.lt.s32.totalorder %v2652_v4, 3  ;;  %v735_v62 = vsel %vm733_vm14, %v723_v60, 2102212464  ;;  %v742_v17 = vsel %vm730_vm0, %v720_v11, %v723_v60 }
  0xfe   : > { %vm731_vm2 = vcmp.lt.s32.totalorder %v2652_v4, 2  ;;  %v738_v18 = vsel %vm730_vm0, %v717_v6, %v720_v11  ;;  %v740_v28 = vsel %vm732_vm1, %v723_v60, %v739_v61  ;;  %v743_v56 = vsel %vm733_vm14, %v729_v13, 1326507024 }
  0xff   : > { %v2286_v1 = vpop.eup %2285  ;;  %vm2688_vm3 = vcmp.le.f32.partialorder %v594_v35, 0.7853982  ;;  %vm2146_vm4 = vcmp.lt.s32.totalorder %v2145_v15, 0  ;;  %v734_v0 = vsel %vm730_vm0, %v714_v49, %v717_v6  ;;  %v744_v24 = vsel %vm732_vm1, %v726_v8, %v743_v56 }
 0x100   : > { %v2288_v57 = vpop.eup %2287  ;;  %v590_v23 = vxor.u32 2147483648, %v2286_v1  ;;  %v665_v26 = vsel %vm2146_vm4, 0, %v2145_v15  ;;  %v736_v25 = vsel %vm732_vm1, %v720_v11, %v735_v62  ;;  %v745_v31 = vsel %vm731_vm2, %v742_v17, %v744_v24 }
 0x101   : > { %v587_v21 = vxor.u32 2147483648, %v2288_v57  ;;  %v666_v35 = vsub.s32 32, %v665_v26  ;;  %v670_v20 = vsub.s32 4294967266, %v665_v26  ;;  %v741_v55 = vsel %vm731_vm2, %v738_v18, %v740_v28 }
 0x102   : > { %v591_v36 = vsel %vm589_vm9, %v590_v23, %v2288_v57  ;;  %v2712_v40 = vmul.u32.u64.low %v2671_v32, %v745_v31  ;;  %v2713_v2 = vmul.u32.u64.high %v2671_v32, %v745_v31, %v2712_v40  ;;  %v805_v12 = vand.u32 2139095040, %v2676_v22 }
 0x103   : > { %v588_v8 = vsel %vm586_vm10, %v2286_v1, %v587_v21  ;;  %v667_v60 = vshll.u32 %v2647_v44, %v665_v26  ;;  %v668_v6 = vshrl.u32 %v2641_v53, %v666_v35  ;;  %v671_v13 = vadd.s32 127, %v670_v20 }
 0x104   : > { %v592_v11 = vsel %vm585_vm12, %v588_v8, %v591_v36  ;;  %v2723_v49 = vmul.u32.u64.low %v2671_v32, %v741_v55  ;;  %v2724_v61 = vmul.u32.u64.high %v2671_v32, %v741_v55, %v2723_v49  ;;  %v806_v15 = vshrl.u32 %v805_v12, 23 }
 0x105   : > { %v593_v7 = vsel %vm582_vm13, nan, %v592_v11  ;;  %vm481_vm5 = vcmp.lt.s32.totalorder %v2637_v51, 2  ;;  %v669_v16 = vor.u32 %v668_v6, %v667_v60  ;;  %v672_v62 = vshll.u32 %v671_v13, 23 }
 0x106   : > { %2052 = vst.msk [vmem:[%s2707_s24 + $0x8] sm:$0xff] %vm2050_vm11, %v593_v7  ;;  %v681_v53 = vsel %vm596_vm15, %v680_v10, %v2633_v14  ;;  %vm482_vm6 = vcmp.eq.s32.totalorder %v2637_v51, 0  ;;  %v737_v58 = vsel %vm731_vm2, %v734_v0, %v736_v25  ;;  %v802_v44 = vand.u32 2147483647, %v2676_v22 }
 0x107   : > { %v2151_v17 = vadd.s32 4294967169, %v806_v15  ;;  %v2290_v1 = vpop.eup %2289  ;;  %vm485_vm7 = vcmp.eq.s32.totalorder %v2637_v51, 2  ;;  %v673_v18 = vor.u32 4788187, %v672_v62  ;;  %vm755_vm8 = vc.u32 %v2713_v2, %v2723_v49 }
 0x108   : > { %v2742_v28 = vadd.f32 %v2437_v54, %v2645_v19  ;;  %v2292_v14 = vpop.eup %2291  ;;  %v486_v10 = vxor.u32 2147483648, %v2290_v1  ;;  %v683_v4 = vsel %vm2688_vm3, 0, %v681_v53  ;;  %v756_v56 = vadd.s32 1, %v2724_v61 }
 0x109   : > { %v812_v57 = vadd.s32 1, %v2151_v17  ;;  %v483_v23 = vxor.u32 2147483648, %v2292_v14  ;;  %v674_v0 = vand.u32 2147483647, %v673_v18  ;;  %v676_v24 = vcvt.s32.f32 %v669_v16 }
 0x10a   : > { %v753_v21 = vmul.u32 %v2671_v32, %v737_v58  ;;  %v487_v26 = vsel %vm485_vm7, %v486_v10, %v2292_v14  ;;  %v757_v25 = vsel %vm755_vm8, %v756_v56, %v2724_v61  ;;  %v809_v54 = vand.u32 8388607, %v802_v44 }
 0x10b   : > { %vm813_vm9 = vcmp.gt.s32.totalorder %v812_v57, 0  ;;  %v484_v19 = vsel %vm482_vm6, %v2290_v1, %v483_v23  ;;  %v677_v31 = vmul.f32 %v676_v24, %v674_v0  ;;  %vm478_vm10 = vweird.f32 %v2443_v59 }
 0x10c   : > { %v758_v36 = vadd.s32 %v757_v25, %v753_v21  ;;  %v814_v35 = vsel %vm813_vm9, %v812_v57, 0  ;;  %v488_v20 = vsel %vm481_vm5, %v484_v19, %v487_v26  ;;  %v687_v40 = vadd.s32 3, %v683_v4 }
 0x10d   : > { %v816_v32 = vand.u32 31, %v814_v35  ;;  %v489_v55 = vsel %vm478_vm10, nan, %v488_v20  ;;  %v678_v8 = vxor.u32 2147483648, %v677_v31  ;;  %v810_v11 = vor.u32 8388608, %v809_v54 }
 0x10e   : > { %v759_v12 = vadd.s32 536870912, %v758_v36  ;;  %2051 = vst.msk [vmem:[%s2707_s24] sm:$0xff] %vm2050_vm11, %v489_v55  ;;  %v815_v60 = vshrl.u32 %v814_v35, 5  ;;  %v909_v13 = vand.u32 2139095040, %v2742_v28  ;;  %v2779_v24 = vand.u32 3, %v687_v40 }
 0x10f   : > { %v817_v6 = vsub.s32 32, %v816_v32  ;;  %v679_v7 = vsel %vm596_vm15, %v678_v8, %v677_v31  ;;  %v819_v59 = vshll.u32 %v2363_v39, %v816_v32  ;;  %v822_v51 = vshll.u32 %v2364_v43, %v816_v32 }
 0x110   : > { %v2761_v61 = vshrl.u32 %v759_v12, 30  ;;  %v682_v15 = vsel %vm2688_vm3, %v2455_v9, %v679_v7  ;;  %v825_v53 = vshll.u32 %v2365_v48, %v816_v32  ;;  %v828_v1 = vshll.u32 %v2366_v50, %v816_v32 }
 0x111   : > { %v820_v16 = vshrl.u32 %v2364_v43, %v817_v6  ;;  %v823_v62 = vshrl.u32 %v2365_v48, %v817_v6  ;;  %2293 = vcosq.f32 %v682_v15  ;;  %v826_v17 = vshrl.u32 %v2366_v50, %v817_v6 }
 0x112   : > { %v761_v58 = vshll.u32 %v2761_v61, 30  ;;  %2295 = vsinq.f32 %v682_v15  ;;  %v829_v14 = vshrl.u32 %v2367_v52, %v817_v6  ;;  %v831_v5 = vshll.u32 %v2367_v52, %v816_v32 }
 0x113   : > { %v821_v18 = vor.u32 %v820_v16, %v819_v59  ;;  %v824_v4 = vor.u32 %v823_v62, %v822_v51  ;;  %v827_v56 = vor.u32 %v826_v17, %v825_v53  ;;  %v832_v57 = vshrl.u32 %v2368_v63, %v817_v6 }
 0x114   : > { %v2776_v10 = vsub.s32 %v758_v36, %v761_v58  ;;  %v830_v23 = vor.u32 %v829_v14, %v828_v1  ;;  %v910_v0 = vshrl.u32 %v909_v13, 23  ;;  %v2782_v25 = vshll.u32 %v810_v11, 8 }
 0x115   : > { %v833_v26 = vor.u32 %v832_v57, %v831_v5  ;;  %v818_v54 = vshrl.u32 %v2363_v39, %v817_v6  ;;  %vm834_vm12 = vcmp.lt.s32.totalorder %v815_v60, 1  ;;  %vm836_vm13 = vcmp.lt.s32.totalorder %v815_v60, 3 }
 0x116   : > { %v764_v21 = vsub.s32 0, %v2776_v10  ;;  %vm837_vm14 = vcmp.lt.s32.totalorder %v815_v60, 4  ;;  %v842_v36 = vsel %vm834_vm12, %v821_v18, %v824_v4  ;;  %v846_v32 = vsel %vm834_vm12, %v824_v4, %v827_v56 }
 0x117   : > { %v839_v31 = vsel %vm837_vm14, %v827_v56, 2102212464  ;;  %v843_v35 = vsel %vm837_vm14, %v830_v23, 920167782  ;;  %v847_v55 = vsel %vm837_vm14, %v833_v26, 1326507024  ;;  %v838_v12 = vsel %vm834_vm12, %v818_v54, %v821_v18 }
 0x118   : > { %v2148_v19 = vmin.u32 %v764_v21, %v2776_v10  ;;  %v844_v20 = vsel %vm836_vm13, %v827_v56, %v843_v35  ;;  %v2155_v8 = vadd.s32 4294967169, %v910_v0  ;;  %vm690_vm15 = vcmp.eq.s32.totalorder %v2779_v24, 0 }
 0x119   : > { %vm835_vm0 = vcmp.lt.s32.totalorder %v815_v60, 2  ;;  %v840_v11 = vsel %vm836_vm13, %v824_v4, %v839_v31  ;;  %v848_v13 = vsel %vm836_vm13, %v830_v23, %v847_v55  ;;  %v906_v7 = vand.u32 2147483647, %v2742_v28 }
 0x11a   : > { %v766_v40 = vclz %v2148_v19  ;;  %v845_v6 = vsel %vm835_vm0, %v842_v36, %v844_v20  ;;  %v916_v59 = vadd.s32 1, %v2155_v8  ;;  %vm686_vm1 = vweird.f32 %v2455_v9 }
 0x11b   : > { %vm700_vm2 = vcmp.lt.s32.totalorder %v2535_v3, 0  ;;  %v849_v15 = vsel %vm835_vm0, %v846_v32, %v848_v13  ;;  %v2794_v16 = vmul.u32.u64.low %v2782_v25, %v845_v6  ;;  %v2795_v62 = vmul.u32.u64.high %v2782_v25, %v845_v6, %v2794_v16 }
 0x11c   : > { %v2149_v51 = vadd.s32 4294967294, %v766_v40  ;;  %v841_v53 = vsel %vm835_vm0, %v838_v12, %v840_v11  ;;  %v2799_v58 = vmul.u32.u64.low %v2782_v25, %v849_v15  ;;  %v2800_v17 = vmul.u32.u64.high %v2782_v25, %v849_v15, %v2799_v58 }
 0x11d   : > { %vm917_vm3 = vcmp.gt.s32.totalorder %v916_v59, 0  ;;  %vm693_vm4 = vcmp.eq.s32.totalorder %v2779_v24, 2  ;;  %v754_v60 = vadd.s32 %v2723_v49, %v2713_v2  ;;  %v784_v5 = vsub.s32 4, %v2761_v61 }
 0x11e   : > { %vm2150_vm5 = vcmp.lt.s32.totalorder %v2149_v51, 0  ;;  %v918_v1 = vsel %vm917_vm3, %v916_v59, 0  ;;  %v2294_v18 = vpop.eup %2293  ;;  %v913_v4 = vand.u32 8388607, %v906_v7  ;;  %v857_v26 = vmul.u32 %v2782_v25, %v841_v53 }
 0x11f   : > { %v769_v14 = vsel %vm2150_vm5, 0, %v2149_v51  ;;  %v920_v56 = vand.u32 31, %v918_v1  ;;  %v2296_v57 = vpop.eup %2295  ;;  %v694_v23 = vxor.u32 2147483648, %v2294_v18  ;;  %vm2811_vm6 = vcmp.le.f32.partialorder %v698_v27, 0.7853982 }
 0x120   : > { %v770_v0 = vsub.s32 32, %v769_v14  ;;  %v774_v21 = vsub.s32 4294967266, %v769_v14  ;;  %v691_v54 = vxor.u32 2147483648, %v2296_v57  ;;  %v771_v49 = vshll.u32 %v2776_v10, %v769_v14 }
 0x121   : > { %vm859_vm7 = vc.u32 %v2800_v17, %v2794_v16  ;;  %v860_v19 = vadd.s32 1, %v2795_v62  ;;  %v695_v31 = vsel %vm693_vm4, %v694_v23, %v2296_v57  ;;  %v921_v35 = vsub.s32 32, %v920_v56 }
 0x122   : > { %v772_v36 = vshrl.u32 %v754_v60, %v770_v0  ;;  %v775_v25 = vadd.s32 127, %v774_v21  ;;  %vm689_vm8 = vcmp.lt.s32.totalorder %v2779_v24, 2  ;;  %v692_v27 = vsel %vm690_vm15, %v2294_v18, %v691_v54 }
 0x123   : > { %v861_v20 = vsel %vm859_vm7, %v860_v19, %v2795_v62  ;;  %v914_v10 = vor.u32 8388608, %v913_v4  ;;  %v696_v32 = vsel %vm689_vm8, %v692_v27, %v695_v31  ;;  %v785_v11 = vsel %vm700_vm2, %v784_v5, %v2761_v61  ;;  %v291_v5 = vpop.permute.xlu1 %290 }
 0x124   : > { %v773_v55 = vor.u32 %v772_v36, %v771_v49  ;;  %v776_v8 = vshll.u32 %v775_v25, 23  ;;  %v862_v40 = vadd.s32 %v861_v20, %v857_v26  ;;  %v697_v12 = vsel %vm686_vm1, nan, %v696_v32  ;;  %v295_v49 = vpop.permute.xlu0 %294 }
 0x125   : > { %v924_v6 = vshrl.u32 %v2364_v43, %v921_v35  ;;  %v927_v13 = vshrl.u32 %v2365_v48, %v921_v35  ;;  %2053 = vst.msk [vmem:[%s2707_s24 + $0x10] sm:$0xff] %vm2050_vm11, %v697_v12  ;;  %v2834_v51 = vshrl.u32 %v918_v1, 5  ;;  %v923_v15 = vshll.u32 %v2363_v39, %v920_v56 }
 0x126   : > { %v777_v24 = vor.u32 4788187, %v776_v8  ;;  %v863_v59 = vadd.s32 536870912, %v862_v40  ;;  %v780_v62 = vcvt.s32.f32 %v773_v55  ;;  %v926_v9 = vshll.u32 %v2364_v43, %v920_v56 }
 0x127   : > { %v929_v53 = vshll.u32 %v2365_v48, %v920_v56  ;;  %v930_v58 = vshrl.u32 %v2366_v50, %v921_v35  ;;  %v932_v18 = vshll.u32 %v2366_v50, %v920_v56  ;;  %v933_v14 = vshrl.u32 %v2367_v52, %v921_v35 }
 0x128   : > { %v778_v61 = vand.u32 2147483647, %v777_v24  ;;  %v2840_v60 = vshrl.u32 %v863_v59, 30  ;;  %v925_v4 = vor.u32 %v924_v6, %v923_v15  ;;  %v928_v1 = vor.u32 %v927_v13, %v926_v9 }
 0x129   : > { %v935_v57 = vshll.u32 %v2367_v52, %v920_v56  ;;  %v936_v23 = vshrl.u32 %v2368_v63, %v921_v35  ;;  %v787_v21 = vsel %vm2811_vm6, 0, %v785_v11  ;;  %v934_v54 = vor.u32 %v933_v14, %v932_v18 }
 0x12a   : > { %v781_v0 = vmul.f32 %v780_v62, %v778_v61  ;;  %v865_v26 = vshll.u32 %v2840_v60, 30  ;;  %v931_v19 = vor.u32 %v930_v58, %v929_v53  ;;  %v2849_v36 = vshll.u32 %v914_v10, 8  ;;  %v2862_v10 = vld [vmem:[%s3779_s1 + $0x1] ss:$0 sm:$0xff] }
 0x12b   : > { %v937_v31 = vor.u32 %v936_v23, %v935_v57  ;;  %v339_v25 = vmul.f32 %v2430_v47, %v291_v5  ;;  %vm938_vm9 = vcmp.lt.s32.totalorder %v2834_v51, 1  ;;  %vm941_vm10 = vcmp.lt.s32.totalorder %v2834_v51, 4 }
 0x12c   : > { %v782_v27 = vxor.u32 2147483648, %v781_v0  ;;  %v2852_v20 = vsub.s32 %v862_v40, %v865_v26  ;;  %v922_v56 = vshrl.u32 %v2363_v39, %v921_v35  ;;  %v946_v32 = vsel %vm938_vm9, %v925_v4, %v928_v1 }
 0x12d   : > { %v947_v55 = vsel %vm941_vm10, %v934_v54, 920167782  ;;  %v340_v47 = vmul.f32 %v2862_v10, %v295_v49  ;;  %vm939_vm12 = vcmp.lt.s32.totalorder %v2834_v51, 2  ;;  %vm940_vm13 = vcmp.lt.s32.totalorder %v2834_v51, 3 }
 0x12e   : > { %v783_v8 = vsel %vm700_vm2, %v782_v27, %v781_v0  ;;  %v868_v40 = vsub.s32 0, %v2852_v20  ;;  %v943_v12 = vsel %vm941_vm10, %v931_v19, 2102212464  ;;  %v948_v11 = vsel %vm940_vm13, %v931_v19, %v947_v55 }
 0x12f   : > { %v786_v35 = vsel %vm2811_vm6, %v2535_v3, %v783_v8  ;;  %v951_v6 = vsel %vm941_vm10, %v937_v31, 1326507024  ;;  %v949_v24 = vsel %vm939_vm12, %v946_v32, %v948_v11  ;;  %v950_v59 = vsel %vm938_vm9, %v928_v1, %v931_v19 }
 0x130   : > { %2297 = vcosq.f32 %v786_v35  ;;  %v2152_v13 = vmin.u32 %v868_v40, %v2852_v20  ;;  %v952_v15 = vsel %vm940_vm13, %v934_v54, %v951_v6  ;;  %v791_v2 = vadd.s32 3, %v787_v21 }
 0x131   : > { %2299 = vsinq.f32 %v786_v35  ;;  %v2879_v62 = vmul.u32.u64.low %v2849_v36, %v949_v24  ;;  %v2880_v9 = vmul.u32.u64.high %v2849_v36, %v949_v24, %v2879_v62  ;;  %v942_v58 = vsel %vm938_vm9, %v922_v56, %v925_v4  ;;  %v2902_v4 = vld [vmem:[%s3779_s1 + $0x2] ss:$0 sm:$0xff] }
 0x132   : > { %v870_v53 = vclz %v2152_v13  ;;  %v944_v61 = vsel %vm940_vm13, %v928_v1, %v943_v12  ;;  %v953_v18 = vsel %vm939_vm12, %v950_v59, %v952_v15  ;;  %v355_v14 = vadd.f32 %v339_v25, %v2409_v30 }
 0x133   : > { %v888_v57 = vsub.s32 4, %v2840_v60  ;;  %v2890_v23 = vmul.u32.u64.low %v2849_v36, %v953_v18  ;;  %v2891_v0 = vmul.u32.u64.high %v2849_v36, %v953_v18, %v2890_v23  ;;  %vm2895_vm14 = vcmp.le.f32.partialorder %v802_v44, 0.7853982 }
 0x134   : > { %v2153_v5 = vadd.s32 4294967294, %v870_v53  ;;  %v2905_v30 = vadd.f32 %v2902_v4, %v355_v14  ;;  %v356_v1 = vadd.f32 %v340_v47, %v2407_v29  ;;  %vm804_vm15 = vcmp.lt.s32.totalorder %v2676_v22, 0  ;;  %v299_v23 = vpop.permute.xlu1 %298 }
 0x135   : > { %v945_v26 = vsel %vm939_vm12, %v942_v58, %v944_v61  ;;  %v964_v44 = vadd.s32 1, %v2880_v9  ;;  %v792_v54 = vand.u32 3, %v791_v2  ;;  %v858_v25 = vadd.s32 %v2794_v16, %v2800_v17 }
 0x136   : > { %vm2154_vm0 = vcmp.lt.s32.totalorder %v2153_v5, 0  ;;  %v1010_v19 = vand.u32 2147483647, %v2905_v30  ;;  %v1013_v31 = vand.u32 2139095040, %v2905_v30  ;;  %v889_v29 = vsel %vm804_vm15, %v888_v57, %v2840_v60 }
 0x137   : > { %v873_v49 = vsel %vm2154_vm0, 0, %v2153_v5  ;;  %v961_v51 = vmul.u32 %v2849_v36, %v945_v26  ;;  %vm963_vm1 = vc.u32 %v2891_v0, %v2879_v62  ;;  %v2923_v55 = vadd.f32 %v2902_v4, %v356_v1 }
 0x138   : > { %v874_v27 = vsub.s32 32, %v873_v49  ;;  %v878_v56 = vsub.s32 4294967266, %v873_v49  ;;  %v1014_v32 = vshrl.u32 %v1013_v31, 23  ;;  %v875_v47 = vshll.u32 %v2852_v20, %v873_v49 }
 0x139   : > { %v965_v16 = vsel %vm963_vm1, %v964_v44, %v2880_v9  ;;  %v891_v17 = vsel %vm2895_vm14, 0, %v889_v29  ;;  %v1017_v36 = vand.u32 8388607, %v1010_v19  ;;  %vm790_vm2 = vweird.f32 %v2535_v3 }
 0x13a   : > { %v876_v8 = vshrl.u32 %v858_v25, %v874_v27  ;;  %v879_v40 = vadd.s32 127, %v878_v56  ;;  %v966_v35 = vadd.s32 %v965_v16, %v961_v51  ;;  %v2159_v60 = vadd.s32 4294967169, %v1014_v32 }
 0x13b   : > { %vm793_vm3 = vcmp.lt.s32.totalorder %v792_v54, 2  ;;  %vm794_vm4 = vcmp.eq.s32.totalorder %v792_v54, 0  ;;  %v1117_v24 = vand.u32 2139095040, %v2923_v55  ;;  %vm797_vm5 = vcmp.eq.s32.totalorder %v792_v54, 2 }
 0x13c   : > { %v877_v12 = vor.u32 %v876_v8, %v875_v47  ;;  %v880_v11 = vshll.u32 %v879_v40, 23  ;;  %v967_v20 = vadd.s32 536870912, %v966_v35  ;;  %v1020_v13 = vadd.s32 1, %v2159_v60 }
 0x13d   : > { %v2298_v6 = vpop.eup %2297  ;;  %v895_v2 = vadd.s32 3, %v891_v17  ;;  %vm908_vm6 = vcmp.lt.s32.totalorder %v2742_v28, 0  ;;  %v1018_v61 = vor.u32 8388608, %v1017_v36  ;;  %v1114_v44 = vand.u32 2147483647, %v2923_v55 }
 0x13e   : > { %v2300_v59 = vpop.eup %2299  ;;  %v798_v15 = vxor.u32 2147483648, %v2298_v6  ;;  %v881_v9 = vor.u32 4788187, %v880_v11  ;;  %v968_v58 = vshrl.u32 %v967_v20, 30  ;;  %vm1021_vm7 = vcmp.gt.s32.totalorder %v1020_v13, 0 }
 0x13f   : > { %v795_v53 = vxor.u32 2147483648, %v2300_v59  ;;  %v884_v5 = vcvt.s32.f32 %v877_v12  ;;  %v1022_v57 = vsel %vm1021_vm7, %v1020_v13, 0  ;;  %v1118_v49 = vshrl.u32 %v1117_v24, 23 }
 0x140   : > { %v799_v18 = vsel %vm797_vm5, %v798_v15, %v2300_v59  ;;  %v882_v14 = vand.u32 2147483647, %v881_v9  ;;  %v969_v26 = vshll.u32 %v968_v58, 30  ;;  %v2937_v27 = vand.u32 3, %v895_v2 }
 0x141   : > { %v796_v1 = vsel %vm794_vm4, %v2298_v6, %v795_v53  ;;  %v1024_v56 = vand.u32 31, %v1022_v57  ;;  %v962_v51 = vadd.s32 %v2879_v62, %v2891_v0  ;;  %v2946_v47 = vmul.f32 %v2862_v10, %v299_v23 }
 0x142   : > { %v800_v31 = vsel %vm793_vm3, %v796_v1, %v799_v18  ;;  %v885_v25 = vmul.f32 %v884_v5, %v882_v14  ;;  %v2943_v32 = vsub.s32 %v966_v35, %v969_v26  ;;  %v992_v54 = vsub.s32 4, %v968_v58 }
 0x143   : > { %v801_v29 = vsel %vm790_vm2, nan, %v800_v31  ;;  %v1025_v40 = vsub.s32 32, %v1024_v56  ;;  %v2950_v16 = vshll.u32 %v1018_v61, 8  ;;  %v1023_v60 = vshrl.u32 %v1022_v57, 5 }
 0x144   : > { %2054 = vst.msk [vmem:[%s2707_s24 + $0x18] sm:$0xff] %vm2050_vm11, %v801_v29  ;;  %v886_v8 = vxor.u32 2147483648, %v885_v25  ;;  %v972_v17 = vsub.s32 0, %v2943_v32  ;;  %v2163_v3 = vadd.s32 4294967169, %v1118_v49  ;;  %v2955_v36 = vand.u32 8388607, %v1114_v44 }
 0x145   : > { %v1027_v0 = vshll.u32 %v2363_v39, %v1024_v56  ;;  %v1028_v35 = vshrl.u32 %v2364_v43, %v1025_v40  ;;  %v1031_v12 = vshrl.u32 %v2365_v48, %v1025_v40  ;;  %v1030_v20 = vshll.u32 %v2364_v43, %v1024_v56 }
 0x146   : > { %v887_v62 = vsel %vm804_vm15, %v886_v8, %v885_v25  ;;  %v2156_v6 = vmin.u32 %v972_v17, %v2943_v32  ;;  %v1034_v13 = vshrl.u32 %v2366_v50, %v1025_v40  ;;  %v2970_v24 = vsel %vm908_vm6, %v992_v54, %v968_v58 }
 0x147   : > { %v890_v11 = vsel %vm2895_vm14, %v2676_v22, %v887_v62  ;;  %v1029_v59 = vor.u32 %v1028_v35, %v1027_v0  ;;  %v1033_v15 = vshll.u32 %v2365_v48, %v1024_v56  ;;  %v1032_v2 = vor.u32 %v1031_v12, %v1030_v20 }
 0x148   : > { %2301 = vcosq.f32 %v890_v11  ;;  %v974_v9 = vclz %v2156_v6  ;;  %vm1042_vm8 = vcmp.lt.s32.totalorder %v1023_v60, 1  ;;  %v1026_v21 = vshrl.u32 %v2363_v39, %v1025_v40 }
 0x149   : > { %2303 = vsinq.f32 %v890_v11  ;;  %v1035_v53 = vor.u32 %v1034_v13, %v1033_v15  ;;  %v1036_v61 = vshll.u32 %v2366_v50, %v1024_v56  ;;  %v1037_v18 = vshrl.u32 %v2367_v52, %v1025_v40 }
 0x14a   : > { %v2157_v14 = vadd.s32 4294967294, %v974_v9  ;;  %v1039_v5 = vshll.u32 %v2367_v52, %v1024_v56  ;;  %v1040_v58 = vshrl.u32 %v2368_v63, %v1025_v40  ;;  %vm1043_vm9 = vcmp.lt.s32.totalorder %v1023_v60, 2 }
 0x14b   : > { %vm2980_vm10 = vcmp.le.f32.partialorder %v906_v7, 0.7853982  ;;  %v1038_v23 = vor.u32 %v1037_v18, %v1036_v61  ;;  %vm1044_vm12 = vcmp.lt.s32.totalorder %v1023_v60, 3  ;;  %vm1045_vm13 = vcmp.lt.s32.totalorder %v1023_v60, 4 }
 0x14c   : > { %v1046_v1 = vsel %vm1042_vm8, %v1026_v21, %v1029_v59  ;;  %vm2158_vm14 = vcmp.lt.s32.totalorder %v2157_v14, 0  ;;  %v1041_v26 = vor.u32 %v1040_v58, %v1039_v5  ;;  %v1047_v49 = vsel %vm1045_vm13, %v1035_v53, 2102212464 }
 0x14d   : > { %v1050_v31 = vsel %vm1042_vm8, %v1029_v59, %v1032_v2  ;;  %v977_v25 = vsel %vm2158_vm14, 0, %v2157_v14  ;;  %v1048_v56 = vsel %vm1044_vm12, %v1032_v2, %v1047_v49  ;;  %v1051_v29 = vsel %vm1045_vm13, %v1038_v23, 920167782 }
 0x14e   : > { %v1124_v7 = vadd.s32 1, %v2163_v3  ;;  %v978_v8 = vsub.s32 32, %v977_v25  ;;  %v979_v54 = vshll.u32 %v2943_v32, %v977_v25  ;;  %v982_v40 = vsub.s32 4294967266, %v977_v25 }
 0x14f   : > { %v1054_v17 = vsel %vm1042_vm8, %v1032_v2, %v1035_v53  ;;  %v1049_v62 = vsel %vm1043_vm9, %v1046_v1, %v1048_v56  ;;  %v1052_v0 = vsel %vm1044_vm12, %v1035_v53, %v1051_v29  ;;  %v1055_v35 = vsel %vm1045_vm13, %v1041_v26, 1326507024 }
 0x150   : > { %vm1125_vm15 = vcmp.gt.s32.totalorder %v1124_v7, 0  ;;  %v980_v12 = vshrl.u32 %v962_v51, %v978_v8  ;;  %v983_v11 = vadd.s32 127, %v982_v40  ;;  %v1053_v6 = vsel %vm1043_vm9, %v1050_v31, %v1052_v0 }
 0x151   : > { %v1056_v20 = vsel %vm1044_vm12, %v1038_v23, %v1055_v35  ;;  %vm894_vm0 = vweird.f32 %v2676_v22  ;;  %v2999_v3 = vmul.u32.u64.low %v2950_v16, %v1053_v6  ;;  %v3000_v13 = vmul.u32.u64.high %v2950_v16, %v1053_v6, %v2999_v3 }
 0x152   : > { %v1057_v32 = vsel %vm1043_vm9, %v1054_v17, %v1056_v20  ;;  %v1126_v59 = vsel %vm1125_vm15, %v1124_v7, 0  ;;  %v981_v15 = vor.u32 %v980_v12, %v979_v54  ;;  %v984_v9 = vshll.u32 %v983_v11, 23  ;;  %v303_v11 = vpop.permute.xlu0 %302 }
 0x153   : > { %v3004_v2 = vmul.u32.u64.low %v2950_v16, %v1057_v32  ;;  %v3005_v51 = vmul.u32.u64.high %v2950_v16, %v1057_v32, %v3004_v2  ;;  %vm897_vm1 = vcmp.lt.s32.totalorder %v2937_v27, 2  ;;  %vm898_vm2 = vcmp.eq.s32.totalorder %v2937_v27, 0 }
 0x154   : > { %vm901_vm3 = vcmp.eq.s32.totalorder %v2937_v27, 2  ;;  %v1128_v60 = vand.u32 31, %v1126_v59  ;;  %v985_v53 = vor.u32 4788187, %v984_v9  ;;  %v995_v61 = vsel %vm2980_vm10, 0, %v2970_v24 }
 0x155   : > { %v2302_v21 = vpop.eup %2301  ;;  %v1122_v18 = vor.u32 8388608, %v2955_v36  ;;  %v357_v14 = vadd.f32 %v2946_v47, %v2413_v34  ;;  %v1065_v23 = vmul.u32 %v2950_v16, %v1049_v62  ;;  %v1068_v1 = vadd.s32 1, %v3000_v13 }
 0x156   : > { %v2304_v5 = vpop.eup %2303  ;;  %v902_v58 = vxor.u32 2147483648, %v2302_v21  ;;  %v1129_v26 = vsub.s32 32, %v1128_v60  ;;  %v986_v31 = vand.u32 2147483647, %v985_v53  ;;  %v988_v25 = vcvt.s32.f32 %v981_v15 }
 0x157   : > { %v899_v49 = vxor.u32 2147483648, %v2304_v5  ;;  %vm1067_vm4 = vc.u32 %v3005_v51, %v2999_v3  ;;  %v3023_v34 = vshrl.u32 %v1126_v59, 5  ;;  %v1131_v7 = vshll.u32 %v2363_v39, %v1128_v60 }
 0x158   : > { %v903_v24 = vsel %vm901_vm3, %v902_v58, %v2304_v5  ;;  %v1069_v36 = vsel %vm1067_vm4, %v1068_v1, %v3000_v13  ;;  %v1132_v47 = vshrl.u32 %v2364_v43, %v1129_v26  ;;  %v989_v56 = vmul.f32 %v988_v25, %v986_v31 }
 0x159   : > { %v900_v16 = vsel %vm898_vm2, %v2302_v21, %v899_v49  ;;  %v1070_v29 = vadd.s32 %v1069_v36, %v1065_v23  ;;  %v1134_v54 = vshll.u32 %v2364_v43, %v1128_v60  ;;  %v1135_v40 = vshrl.u32 %v2365_v48, %v1129_v26 }
 0x15a   : > { %v904_v8 = vsel %vm897_vm1, %v900_v16, %v903_v24  ;;  %v1137_v17 = vshll.u32 %v2365_v48, %v1128_v60  ;;  %v990_v0 = vxor.u32 2147483648, %v989_v56  ;;  %v1138_v12 = vshrl.u32 %v2366_v50, %v1129_v26 }
 0x15b   : > { %v905_v62 = vsel %vm894_vm0, nan, %v904_v8  ;;  %v1071_v35 = vadd.s32 536870912, %v1070_v29  ;;  %v1133_v6 = vor.u32 %v1132_v47, %v1131_v7  ;;  %v1136_v20 = vor.u32 %v1135_v40, %v1134_v54 }
 0x15c   : > { %2055 = vst.msk [vmem:[%s2707_s24 + $0x20] sm:$0xff] %vm2050_vm11, %v905_v62  ;;  %v1140_v27 = vshll.u32 %v2366_v50, %v1128_v60  ;;  %v1141_v32 = vshrl.u32 %v2367_v52, %v1129_v26  ;;  %v991_v13 = vsel %vm908_vm6, %v990_v0, %v989_v56  ;;  %v1139_v15 = vor.u32 %v1138_v12, %v1137_v17 }
 0x15d   : > { %v1072_v59 = vshrl.u32 %v1071_v35, 30  ;;  %v1144_v22 = vshrl.u32 %v2368_v63, %v1129_v26  ;;  %v994_v9 = vsel %vm2980_vm10, %v2742_v28, %v991_v13  ;;  %v1143_v21 = vshll.u32 %v2367_v52, %v1128_v60 }
 0x15e   : > { %v1142_v2 = vor.u32 %v1141_v32, %v1140_v27  ;;  %v342_v53 = vmul.f32 %v2862_v10, %v303_v11  ;;  %2305 = vcosq.f32 %v994_v9  ;;  %v999_v5 = vadd.s32 3, %v995_v61 }
 0x15f   : > { %v1073_v58 = vshll.u32 %v1072_v59, 30  ;;  %v3049_v23 = vshll.u32 %v1122_v18, 8  ;;  %2307 = vsinq.f32 %v994_v9  ;;  %v1145_v1 = vor.u32 %v1144_v22, %v1143_v21 }
 0x160   : > { %vm1146_vm5 = vcmp.lt.s32.totalorder %v3023_v34, 1  ;;  %vm1149_vm6 = vcmp.lt.s32.totalorder %v3023_v34, 4  ;;  %v3058_v60 = vadd.f32 %v2902_v4, %v357_v14  ;;  %v1130_v61 = vshrl.u32 %v2363_v39, %v1129_v26 }
 0x161   : > { %v3053_v49 = vsub.s32 %v1070_v29, %v1073_v58  ;;  %v1151_v57 = vsel %vm1149_vm6, %v1139_v15, 2102212464  ;;  %v1154_v31 = vsel %vm1146_vm5, %v1133_v6, %v1136_v20  ;;  %vm1147_vm7 = vcmp.lt.s32.totalorder %v3023_v34, 2 }
 0x162   : > { %vm1148_vm8 = vcmp.lt.s32.totalorder %v3023_v34, 3  ;;  %v1155_v18 = vsel %vm1149_vm6, %v1142_v2, 920167782  ;;  %v1096_v24 = vsub.s32 4, %v1072_v59  ;;  %v1158_v47 = vsel %vm1146_vm5, %v1136_v20, %v1139_v15 }
 0x163   : > { %v1076_v25 = vsub.s32 0, %v3053_v49  ;;  %v1156_v36 = vsel %vm1148_vm8, %v1139_v15, %v1155_v18  ;;  %v1150_v16 = vsel %vm1146_vm5, %v1130_v61, %v1133_v6  ;;  %v1152_v56 = vsel %vm1148_vm8, %v1136_v20, %v1151_v57 }
 0x164   : > { %v1157_v14 = vsel %vm1147_vm7, %v1154_v31, %v1156_v36  ;;  %v1159_v26 = vsel %vm1149_vm6, %v1145_v1, 1326507024  ;;  %vm1012_vm9 = vcmp.lt.s32.totalorder %v2905_v30, 0  ;;  %v358_v8 = vadd.f32 %v342_v53, %v2411_v33 }
 0x165   : > { %v2160_v29 = vmin.u32 %v1076_v25, %v3053_v49  ;;  %v1160_v7 = vsel %vm1148_vm8, %v1142_v2, %v1159_v26  ;;  %v1000_v54 = vand.u32 3, %v999_v5  ;;  %v1097_v35 = vsel %vm1012_vm9, %v1096_v24, %v1072_v59 }
 0x166   : > { %v1161_v40 = vsel %vm1147_vm7, %v1158_v47, %v1160_v7  ;;  %v3076_v17 = vmul.u32.u64.low %v3049_v23, %v1157_v14  ;;  %v3077_v62 = vmul.u32.u64.high %v3049_v23, %v1157_v14, %v3076_v17  ;;  %v1153_v12 = vsel %vm1147_vm7, %v1150_v16, %v1152_v56  ;;  %v307_v7 = vpop.permute.xlu1 %306 }
 0x167   : > { %v1078_v0 = vclz %v2160_v29  ;;  %v3085_v11 = vmul.u32.u64.low %v3049_v23, %v1161_v40  ;;  %v3086_v6 = vmul.u32.u64.high %v3049_v23, %v1161_v40, %v3085_v11  ;;  %v1218_v33 = vand.u32 2147483647, %v3058_v60 }
 0x168   : > { %v1221_v20 = vand.u32 2139095040, %v3058_v60  ;;  %vm998_vm10 = vweird.f32 %v2742_v28  ;;  %vm3093_vm12 = vcmp.le.f32.partialorder %v1010_v19, 0.7853982  ;;  %v3098_v34 = vadd.f32 %v2902_v4, %v358_v8 }
 0x169   : > { %v2161_v32 = vadd.s32 4294967294, %v1078_v0  ;;  %vm1002_vm13 = vcmp.eq.s32.totalorder %v1000_v54, 0  ;;  %vm1005_vm14 = vcmp.eq.s32.totalorder %v1000_v54, 2  ;;  %v1172_v13 = vadd.s32 1, %v3077_v62 }
 0x16a   : > { %v1222_v59 = vshrl.u32 %v1221_v20, 23  ;;  %v1066_v15 = vadd.s32 %v2999_v3, %v3005_v51  ;;  %v1099_v22 = vsel %vm3093_vm12, 0, %v1097_v35  ;;  %v1169_v19 = vmul.u32 %v3049_v23, %v1153_v12 }
 0x16b   : > { %vm2162_vm15 = vcmp.lt.s32.totalorder %v2161_v32, 0  ;;  %v2306_v9 = vpop.eup %2305  ;;  %vm1171_vm0 = vc.u32 %v3086_v6, %v3076_v17  ;;  %v1225_v53 = vand.u32 8388607, %v1218_v33  ;;  %v1325_v3 = vand.u32 2139095040, %v3098_v34 }
 0x16c   : > { %v1081_v2 = vsel %vm2162_vm15, 0, %v2161_v32  ;;  %v2167_v21 = vadd.s32 4294967169, %v1222_v59  ;;  %v2308_v5 = vpop.eup %2307  ;;  %v1006_v58 = vxor.u32 2147483648, %v2306_v9  ;;  %v1173_v23 = vsel %vm1171_vm0, %v1172_v13, %v3077_v62 }
 0x16d   : > { %v1082_v1 = vsub.s32 32, %v1081_v2  ;;  %v1086_v57 = vsub.s32 4294967266, %v1081_v2  ;;  %v1003_v51 = vxor.u32 2147483648, %v2308_v5  ;;  %v1083_v31 = vshll.u32 %v3053_v49, %v1081_v2  ;;  %v311_v49 = vpop.permute.xlu0 %310 }
 0x16e   : > { %v1228_v61 = vadd.s32 1, %v2167_v21  ;;  %v1007_v18 = vsel %vm1005_vm14, %v1006_v58, %v2308_v5  ;;  %v1174_v36 = vadd.s32 %v1173_v23, %v1169_v19  ;;  %vm1001_vm1 = vcmp.lt.s32.totalorder %v1000_v54, 2 }
 0x16f   : > { %v1084_v25 = vshrl.u32 %v1066_v15, %v1082_v1  ;;  %v1087_v24 = vadd.s32 127, %v1086_v57  ;;  %v1004_v47 = vsel %vm1002_vm13, %v2306_v9, %v1003_v51  ;;  %v1103_v16 = vadd.s32 3, %v1099_v22 }
 0x170   : > { %vm1229_vm2 = vcmp.gt.s32.totalorder %v1228_v61, 0  ;;  %v1008_v56 = vsel %vm1001_vm1, %v1004_v47, %v1007_v18  ;;  %v1175_v29 = vadd.s32 536870912, %v1174_v36  ;;  %v1226_v40 = vor.u32 8388608, %v1225_v53 }
 0x171   : > { %v1085_v14 = vor.u32 %v1084_v25, %v1083_v31  ;;  %v1088_v26 = vshll.u32 %v1087_v24, 23  ;;  %v1009_v8 = vsel %vm998_vm10, nan, %v1008_v56  ;;  %v1230_v62 = vsel %vm1229_vm2, %v1228_v61, 0 }
 0x172   : > { %v1326_v0 = vshrl.u32 %v1325_v3, 23  ;;  %2056 = vst.msk [vmem:[%s2707_s24 + $0x28] sm:$0xff] %vm2050_vm11, %v1009_v8  ;;  %v1176_v12 = vshrl.u32 %v1175_v29, 30  ;;  %v1322_v54 = vand.u32 2147483647, %v3098_v34  ;;  %v1232_v11 = vand.u32 31, %v1230_v62 }
 0x173   : > { %v1089_v35 = vor.u32 4788187, %v1088_v26  ;;  %v3121_v20 = vmul.f32 %v2862_v10, %v307_v7  ;;  %v3124_v32 = vmul.f32 %v2862_v10, %v311_v49  ;;  %v1092_v59 = vcvt.s32.f32 %v1085_v14 }
 0x174   : > { %v3126_v28 = vand.u32 3, %v1103_v16  ;;  %vm1116_vm3 = vcmp.lt.s32.totalorder %v2923_v55, 0  ;;  %v1177_v15 = vshll.u32 %v1176_v12, 30  ;;  %v1170_v22 = vadd.s32 %v3076_v17, %v3086_v6 }
 0x175   : > { %v1090_v13 = vand.u32 2147483647, %v1089_v35  ;;  %v1233_v19 = vsub.s32 32, %v1232_v11  ;;  %v3131_v9 = vshll.u32 %v1226_v40, 8  ;;  %v2171_v2 = vadd.s32 4294967169, %v1326_v0 }
 0x176   : > { %v3133_v53 = vsub.s32 %v1174_v36, %v1177_v15  ;;  %v1231_v5 = vshrl.u32 %v1230_v62, 5  ;;  %v3137_v58 = vand.u32 8388607, %v1322_v54  ;;  %v1200_v1 = vsub.s32 4, %v1176_v12 }
 0x177   : > { %v1093_v21 = vmul.f32 %v1092_v59, %v1090_v13  ;;  %v1235_v57 = vshll.u32 %v2363_v39, %v1232_v11  ;;  %v1236_v3 = vshrl.u32 %v2364_v43, %v1233_v19  ;;  %v1239_v51 = vshrl.u32 %v2365_v48, %v1233_v19 }
 0x178   : > { %vm3144_vm4 = vcmp.le.f32.partialorder %v1114_v44, 0.7853982  ;;  %v1180_v31 = vsub.s32 0, %v3133_v53  ;;  %v1238_v23 = vshll.u32 %v2364_v43, %v1232_v11  ;;  %v1242_v61 = vshrl.u32 %v2366_v50, %v1233_v19 }
 0x179   : > { %v1094_v17 = vxor.u32 2147483648, %v1093_v21  ;;  %v1237_v18 = vor.u32 %v1236_v3, %v1235_v57  ;;  %v1241_v25 = vshll.u32 %v2365_v48, %v1232_v11  ;;  %v1244_v24 = vshll.u32 %v2366_v50, %v1232_v11 }
 0x17a   : > { %v1245_v36 = vshrl.u32 %v2367_v52, %v1233_v19  ;;  %v2164_v44 = vmin.u32 %v1180_v31, %v3133_v53  ;;  %v1240_v16 = vor.u32 %v1239_v51, %v1238_v23  ;;  %v1247_v56 = vshll.u32 %v2367_v52, %v1232_v11 }
 0x17b   : > { %v1095_v47 = vsel %vm1012_vm9, %v1094_v17, %v1093_v21  ;;  %v1243_v26 = vor.u32 %v1242_v61, %v1241_v25  ;;  %v1248_v7 = vshrl.u32 %v2368_v63, %v1233_v19  ;;  %vm1250_vm5 = vcmp.lt.s32.totalorder %v1231_v5, 1 }
 0x17c   : > { %v1098_v14 = vsel %vm3093_vm12, %v2905_v30, %v1095_v47  ;;  %v1246_v29 = vor.u32 %v1245_v36, %v1244_v24  ;;  %v1182_v49 = vclz %v2164_v44  ;;  %v1332_v8 = vadd.s32 1, %v2171_v2 }
 0x17d   : > { %2309 = vcosq.f32 %v1098_v14  ;;  %v1201_v40 = vsel %vm1116_vm3, %v1200_v1, %v1176_v12  ;;  %v1234_v62 = vshrl.u32 %v2363_v39, %v1233_v19  ;;  %v1249_v0 = vor.u32 %v1248_v7, %v1247_v56 }
 0x17e   : > { %2311 = vsinq.f32 %v1098_v14  ;;  %v2165_v35 = vadd.s32 4294967294, %v1182_v49  ;;  %vm1252_vm6 = vcmp.lt.s32.totalorder %v1231_v5, 3  ;;  %vm1253_vm7 = vcmp.lt.s32.totalorder %v1231_v5, 4 }
 0x17f   : > { %v1258_v27 = vsel %vm1250_vm5, %v1237_v18, %v1240_v16  ;;  %v1255_v11 = vsel %vm1253_vm7, %v1243_v26, 2102212464  ;;  %v1259_v13 = vsel %vm1253_vm7, %v1246_v29, 920167782  ;;  %v1262_v59 = vsel %vm1250_vm5, %v1240_v16, %v1243_v26 }
 0x180   : > { %v1263_v15 = vsel %vm1253_vm7, %v1249_v0, 1326507024  ;;  %vm2166_vm8 = vcmp.lt.s32.totalorder %v2165_v35, 0  ;;  %vm1251_vm9 = vcmp.lt.s32.totalorder %v1231_v5, 2  ;;  %v1260_v2 = vsel %vm1252_vm6, %v1243_v26, %v1259_v13 }
 0x181   : > { %v1264_v21 = vsel %vm1252_vm6, %v1246_v29, %v1263_v15  ;;  %v1185_v12 = vsel %vm2166_vm8, 0, %v2165_v35  ;;  %v1203_v19 = vsel %vm3144_vm4, 0, %v1201_v40  ;;  %v1261_v1 = vsel %vm1251_vm9, %v1258_v27, %v1260_v2 }
 0x182   : > { %v1265_v57 = vsel %vm1251_vm9, %v1262_v59, %v1264_v21  ;;  %v1186_v3 = vsub.s32 32, %v1185_v12  ;;  %v1190_v51 = vsub.s32 4294967266, %v1185_v12  ;;  %v1254_v17 = vsel %vm1250_vm5, %v1234_v62, %v1237_v18 }
 0x183   : > { %v1256_v31 = vsel %vm1252_vm6, %v1240_v16, %v1255_v11  ;;  %v3176_v23 = vmul.u32.u64.low %v3131_v9, %v1265_v57  ;;  %v3177_v61 = vmul.u32.u64.high %v3131_v9, %v1265_v57, %v3176_v23  ;;  %v1187_v36 = vshll.u32 %v3133_v53, %v1185_v12 }
 0x184   : > { %v3180_v25 = vmul.u32.u64.low %v3131_v9, %v1261_v1  ;;  %v3181_v24 = vmul.u32.u64.high %v3131_v9, %v1261_v1, %v3180_v25  ;;  %v1188_v47 = vshrl.u32 %v1170_v22, %v1186_v3  ;;  %v1191_v44 = vadd.s32 127, %v1190_v51 }
 0x185   : > { %vm1333_vm10 = vcmp.gt.s32.totalorder %v1332_v8, 0  ;;  %vm1105_vm12 = vcmp.lt.s32.totalorder %v3126_v28, 2  ;;  %vm1106_vm13 = vcmp.eq.s32.totalorder %v3126_v28, 0  ;;  %v1207_v18 = vadd.s32 3, %v1203_v19 }
 0x186   : > { %v1257_v16 = vsel %vm1251_vm9, %v1254_v17, %v1256_v31  ;;  %v1334_v56 = vsel %vm1333_vm10, %v1332_v8, 0  ;;  %vm1102_vm14 = vweird.f32 %v2905_v30  ;;  %vm1109_vm15 = vcmp.eq.s32.totalorder %v3126_v28, 2 }
 0x187   : > { %v1189_v14 = vor.u32 %v1188_v47, %v1187_v36  ;;  %v1192_v26 = vshll.u32 %v1191_v44, 23  ;;  %v1336_v29 = vand.u32 31, %v1334_v56  ;;  %vm1275_vm0 = vc.u32 %v3177_v61, %v3180_v25 }
 0x188   : > { %v1276_v22 = vadd.s32 1, %v3181_v24  ;;  %v359_v53 = vadd.f32 %v3121_v20, %v2417_v38  ;;  %v3197_v5 = vadd.f32 %v3124_v32, %v2415_v37  ;;  %v1273_v49 = vmul.u32 %v3131_v9, %v1257_v16 }
 0x189   : > { %v1193_v7 = vor.u32 4788187, %v1192_v26  ;;  %v1330_v8 = vor.u32 8388608, %v3137_v58  ;;  %v1337_v40 = vsub.s32 32, %v1336_v29  ;;  %v1196_v0 = vcvt.s32.f32 %v1189_v14 }
 0x18a   : > { %v2310_v62 = vpop.eup %2309  ;;  %v3201_v35 = vand.u32 3, %v1207_v18  ;;  %v1277_v27 = vsel %vm1275_vm0, %v1276_v22, %v3181_v24  ;;  %v3204_v11 = vshrl.u32 %v1334_v56, 5  ;;  %v1339_v37 = vshll.u32 %v2363_v39, %v1336_v29 }
 0x18b   : > { %v2312_v13 = vpop.eup %2311  ;;  %v1110_v38 = vxor.u32 2147483648, %v2310_v62  ;;  %v1194_v20 = vand.u32 2147483647, %v1193_v7  ;;  %v1278_v59 = vadd.s32 %v1277_v27, %v1273_v49  ;;  %v1340_v9 = vshrl.u32 %v2364_v43, %v1337_v40 }
 0x18c   : > { %v1107_v32 = vxor.u32 2147483648, %v2312_v13  ;;  %v1343_v58 = vshrl.u32 %v2365_v48, %v1337_v40  ;;  %v1346_v15 = vshrl.u32 %v2366_v50, %v1337_v40  ;;  %v1349_v19 = vshrl.u32 %v2367_v52, %v1337_v40 }
 0x18d   : > { %v1111_v2 = vsel %vm1109_vm15, %v1110_v38, %v2312_v13  ;;  %v1197_v21 = vmul.f32 %v1196_v0, %v1194_v20  ;;  %v1279_v12 = vadd.s32 536870912, %v1278_v59  ;;  %v1342_v57 = vshll.u32 %v2364_v43, %v1336_v29 }
 0x18e   : > { %v1108_v1 = vsel %vm1106_vm13, %v2310_v62, %v1107_v32  ;;  %v1345_v3 = vshll.u32 %v2365_v48, %v1336_v29  ;;  %v1348_v51 = vshll.u32 %v2366_v50, %v1336_v29  ;;  %v1341_v24 = vor.u32 %v1340_v9, %v1339_v37 }
 0x18f   : > { %v1112_v17 = vsel %vm1105_vm12, %v1108_v1, %v1111_v2  ;;  %v1198_v31 = vxor.u32 2147483648, %v1197_v21  ;;  %v1280_v23 = vshrl.u32 %v1279_v12, 30  ;;  %v1344_v47 = vor.u32 %v1343_v58, %v1342_v57 }
 0x190   : > { %v1113_v36 = vsel %vm1102_vm14, nan, %v1112_v17  ;;  %v1351_v44 = vshll.u32 %v2367_v52, %v1336_v29  ;;  %v1352_v18 = vshrl.u32 %v2368_v63, %v1337_v40  ;;  %v1347_v14 = vor.u32 %v1346_v15, %v1345_v3 }
 0x191   : > { %2057 = vst.msk [vmem:[%s2707_s24 + $0x30] sm:$0xff] %vm2050_vm11, %v1113_v36  ;;  %v1199_v16 = vsel %vm1116_vm3, %v1198_v31, %v1197_v21  ;;  %v1281_v56 = vshll.u32 %v1280_v23, 30  ;;  %v1350_v28 = vor.u32 %v1349_v19, %v1348_v51  ;;  %v1370_v30 = vshll.u32 %v1330_v8, 8 }
 0x192   : > { %v1202_v26 = vsel %vm3144_vm4, %v2923_v55, %v1199_v16  ;;  %v1353_v22 = vor.u32 %v1352_v18, %v1351_v44  ;;  %v3232_v7 = vadd.f32 %v2902_v4, %v359_v53  ;;  %v1338_v49 = vshrl.u32 %v2363_v39, %v1337_v40 }
 0x193   : > { %2313 = vcosq.f32 %v1202_v26  ;;  %v3234_v29 = vsub.s32 %v1278_v59, %v1281_v56  ;;  %vm1354_vm1 = vcmp.lt.s32.totalorder %v3204_v11, 1  ;;  %v1304_v62 = vsub.s32 4, %v1280_v23 }
 0x194   : > { %2315 = vsinq.f32 %v1202_v26  ;;  %vm1357_vm2 = vcmp.lt.s32.totalorder %v3204_v11, 4  ;;  %v1362_v0 = vsel %vm1354_vm1, %v1341_v24, %v1344_v47  ;;  %vm1356_vm3 = vcmp.lt.s32.totalorder %v3204_v11, 3 }
 0x195   : > { %v1284_v6 = vsub.s32 0, %v3234_v29  ;;  %v1359_v8 = vsel %vm1357_vm2, %v1347_v14, 2102212464  ;;  %v1363_v27 = vsel %vm1357_vm2, %v1350_v28, 920167782  ;;  %vm1355_vm4 = vcmp.lt.s32.totalorder %v3204_v11, 2 }
 0x196   : > { %v1364_v53 = vsel %vm1356_vm3, %v1347_v14, %v1363_v27  ;;  %v1366_v13 = vsel %vm1354_vm1, %v1344_v47, %v1347_v14  ;;  %v1367_v38 = vsel %vm1357_vm2, %v1353_v22, 1326507024  ;;  %v1358_v20 = vsel %vm1354_vm1, %v1338_v49, %v1341_v24 }
 0x197   : > { %v2168_v40 = vmin.u32 %v1284_v6, %v3234_v29  ;;  %v1365_v59 = vsel %vm1355_vm4, %v1362_v0, %v1364_v53  ;;  %v1368_v37 = vsel %vm1356_vm3, %v1350_v28, %v1367_v38  ;;  %v1360_v32 = vsel %vm1356_vm3, %v1344_v47, %v1359_v8 }
 0x198   : > { %v1369_v9 = vsel %vm1355_vm4, %v1366_v13, %v1368_v37  ;;  %v3247_v58 = vmul.u32.u64.low %v1370_v30, %v1365_v59  ;;  %v3248_v15 = vmul.u32.u64.high %v1370_v30, %v1365_v59, %v3247_v58  ;;  %vm1220_vm5 = vcmp.lt.s32.totalorder %v3058_v60, 0  ;;  %v315_v37 = vpop.permute.xlu1 %314 }
 0x199   : > { %v1286_v2 = vclz %v2168_v40  ;;  %v3254_v21 = vadd.f32 %v2902_v4, %v3197_v5  ;;  %vm3258_vm6 = vcmp.le.f32.partialorder %v1218_v33, 0.7853982  ;;  %v1426_v57 = vand.u32 2147483647, %v3232_v7 }
 0x19a   : > { %v3262_v19 = vmul.u32.u64.low %v1370_v30, %v1369_v9  ;;  %v3263_v1 = vmul.u32.u64.high %v1370_v30, %v1369_v9, %v3262_v19  ;;  %v1305_v51 = vsel %vm1220_vm5, %v1304_v62, %v1280_v23  ;;  %v1361_v17 = vsel %vm1355_vm4, %v1358_v20, %v1360_v32 }
 0x19b   : > { %v2169_v3 = vadd.s32 4294967294, %v1286_v2  ;;  %v1429_v4 = vand.u32 2139095040, %v3232_v7  ;;  %vm1209_vm7 = vcmp.lt.s32.totalorder %v3201_v35, 2  ;;  %vm1210_vm8 = vcmp.eq.s32.totalorder %v3201_v35, 0 }
 0x19c   : > { %vm1213_vm9 = vcmp.eq.s32.totalorder %v3201_v35, 2  ;;  %v1380_v33 = vadd.s32 1, %v3248_v15  ;;  %vm1206_vm10 = vweird.f32 %v2923_v55  ;;  %v1274_v5 = vadd.s32 %v3180_v25, %v3177_v61 }
 0x19d   : > { %vm2170_vm12 = vcmp.lt.s32.totalorder %v2169_v3, 0  ;;  %v1430_v31 = vshrl.u32 %v1429_v4, 23  ;;  %v1533_v11 = vand.u32 2139095040, %v3254_v21  ;;  %v1307_v24 = vsel %vm3258_vm6, 0, %v1305_v51 }
 0x19e   : > { %v1289_v23 = vsel %vm2170_vm12, 0, %v2169_v3  ;;  %v1377_v36 = vmul.u32 %v1370_v30, %v1361_v17  ;;  %vm1379_vm13 = vc.u32 %v3263_v1, %v3247_v58  ;;  %v1433_v16 = vand.u32 8388607, %v1426_v57 }
 0x19f   : > { %v1290_v47 = vsub.s32 32, %v1289_v23  ;;  %v1294_v44 = vsub.s32 4294967266, %v1289_v23  ;;  %v1381_v18 = vsel %vm1379_vm13, %v1380_v33, %v3248_v15  ;;  %v1291_v25 = vshll.u32 %v3234_v29, %v1289_v23 }
 0x1a0   : > { %v2314_v61 = vpop.eup %2313  ;;  %v1382_v56 = vadd.s32 %v1381_v18, %v1377_v36  ;;  %v2175_v14 = vadd.s32 4294967169, %v1430_v31  ;;  %v1530_v28 = vand.u32 2147483647, %v3254_v21  ;;  %v1534_v62 = vshrl.u32 %v1533_v11, 23 }
 0x1a1   : > { %v2316_v26 = vpop.eup %2315  ;;  %v1214_v22 = vxor.u32 2147483648, %v2314_v61  ;;  %v1292_v30 = vshrl.u32 %v1274_v5, %v1290_v47  ;;  %v1295_v49 = vadd.s32 127, %v1294_v44  ;;  %v1311_v6 = vadd.s32 3, %v1307_v24 }
 0x1a2   : > { %v1211_v0 = vxor.u32 2147483648, %v2316_v26  ;;  %v1383_v8 = vadd.s32 536870912, %v1382_v56  ;;  %v1436_v27 = vadd.s32 1, %v2175_v14  ;;  %v1434_v29 = vor.u32 8388608, %v1433_v16 }
 0x1a3   : > { %v1215_v53 = vsel %vm1213_vm9, %v1214_v22, %v2316_v26  ;;  %v1293_v13 = vor.u32 %v1292_v30, %v1291_v25  ;;  %v1296_v38 = vshll.u32 %v1295_v49, 23  ;;  %v3294_v59 = vand.u32 8388607, %v1530_v28 }
 0x1a4   : > { %v1212_v40 = vsel %vm1210_vm8, %v2314_v61, %v1211_v0  ;;  %v1384_v20 = vshrl.u32 %v1383_v8, 30  ;;  %vm1437_vm14 = vcmp.gt.s32.totalorder %v1436_v27, 0  ;;  %v2179_v2 = vadd.s32 4294967169, %v1534_v62 }
 0x1a5   : > { %v1216_v32 = vsel %vm1209_vm7, %v1212_v40, %v1215_v53  ;;  %v1297_v9 = vor.u32 4788187, %v1296_v38  ;;  %v1438_v15 = vsel %vm1437_vm14, %v1436_v27, 0  ;;  %vm1324_vm15 = vcmp.lt.s32.totalorder %v3098_v34, 0 }
 0x1a6   : > { %v1217_v19 = vsel %vm1206_vm10, nan, %v1216_v32  ;;  %v1385_v3 = vshll.u32 %v1384_v20, 30  ;;  %v1300_v17 = vcvt.s32.f32 %v1293_v13  ;;  %v1440_v4 = vand.u32 31, %v1438_v15 }
 0x1a7   : > { %2058 = vst.msk [vmem:[%s2707_s24 + $0x38] sm:$0xff] %vm2050_vm11, %v1217_v19  ;;  %v1298_v51 = vand.u32 2147483647, %v1297_v9  ;;  %v3304_v33 = vmul.f32 %v2862_v10, %v315_v37  ;;  %v3306_v5 = vand.u32 3, %v1311_v6  ;;  %v1378_v35 = vadd.s32 %v3247_v58, %v3263_v1 }
 0x1a8   : > { %v3310_v31 = vsub.s32 %v1382_v56, %v1385_v3  ;;  %v3312_v55 = vshll.u32 %v1434_v29, 8  ;;  %v1441_v23 = vsub.s32 32, %v1440_v4  ;;  %v1538_v24 = vor.u32 8388608, %v3294_v59 }
 0x1a9   : > { %v1301_v11 = vmul.f32 %v1300_v17, %v1298_v51  ;;  %v1540_v36 = vadd.s32 1, %v2179_v2  ;;  %v1408_v44 = vsub.s32 4, %v1384_v20  ;;  %v1439_v18 = vshrl.u32 %v1438_v15, 5 }
 0x1aa   : > { %v1388_v47 = vsub.s32 0, %v3310_v31  ;;  %v1443_v10 = vshll.u32 %v2363_v39, %v1440_v4  ;;  %v1444_v61 = vshrl.u32 %v2364_v43, %v1441_v23  ;;  %v1446_v58 = vshll.u32 %v2364_v43, %v1440_v4 }
 0x1ab   : > { %v1302_v16 = vxor.u32 2147483648, %v1301_v11  ;;  %v1447_v1 = vshrl.u32 %v2365_v48, %v1441_v23  ;;  %v1449_v56 = vshll.u32 %v2365_v48, %v1440_v4  ;;  %v1450_v14 = vshrl.u32 %v2366_v50, %v1441_v23 }
 0x1ac   : > { %v2172_v25 = vmin.u32 %v1388_v47, %v3310_v31  ;;  %v1452_v26 = vshll.u32 %v2366_v50, %v1440_v4  ;;  %v1445_v30 = vor.u32 %v1444_v61, %v1443_v10  ;;  %v1453_v62 = vshrl.u32 %v2367_v52, %v1441_v23 }
 0x1ad   : > { %v1303_v22 = vsel %vm1220_vm5, %v1302_v16, %v1301_v11  ;;  %v1448_v49 = vor.u32 %v1447_v1, %v1446_v58  ;;  %v3332_v8 = vsel %vm1324_vm15, %v1408_v44, %v1384_v20  ;;  %vm1541_vm0 = vcmp.gt.s32.totalorder %v1540_v36, 0 }
 0x1ae   : > { %v1306_v0 = vsel %vm3258_vm6, %v3058_v60, %v1303_v22  ;;  %v1390_v6 = vclz %v2172_v25  ;;  %v1451_v27 = vor.u32 %v1450_v14, %v1449_v56  ;;  %v1454_v53 = vor.u32 %v1453_v62, %v1452_v26 }
 0x1af   : > { %2317 = vcosq.f32 %v1306_v0  ;;  %vm1458_vm1 = vcmp.lt.s32.totalorder %v1439_v18, 1  ;;  %vm3336_vm2 = vcmp.le.f32.partialorder %v1322_v54, 0.7853982  ;;  %v1455_v12 = vshll.u32 %v2367_v52, %v1440_v4 }
 0x1b0   : > { %2319 = vsinq.f32 %v1306_v0  ;;  %v2173_v38 = vadd.s32 4294967294, %v1390_v6  ;;  %v1456_v29 = vshrl.u32 %v2368_v63, %v1441_v23  ;;  %v1442_v40 = vshrl.u32 %v2363_v39, %v1441_v23 }
 0x1b1   : > { %vm1460_vm3 = vcmp.lt.s32.totalorder %v1439_v18, 3  ;;  %vm1461_vm4 = vcmp.lt.s32.totalorder %v1439_v18, 4  ;;  %v1466_v20 = vsel %vm1458_vm1, %v1445_v30, %v1448_v49  ;;  %vm1459_vm6 = vcmp.lt.s32.totalorder %v1439_v18, 2 }
 0x1b2   : > { %vm2174_vm5 = vcmp.lt.s32.totalorder %v2173_v38, 0  ;;  %v1457_v37 = vor.u32 %v1456_v29, %v1455_v12  ;;  %v1463_v32 = vsel %vm1461_vm4, %v1451_v27, 2102212464  ;;  %v1467_v54 = vsel %vm1461_vm4, %v1454_v53, 920167782 }
 0x1b3   : > { %v1393_v9 = vsel %vm2174_vm5, 0, %v2173_v38  ;;  %v1462_v15 = vsel %vm1458_vm1, %v1442_v40, %v1445_v30  ;;  %v1464_v2 = vsel %vm1460_vm3, %v1448_v49, %v1463_v32  ;;  %v1468_v19 = vsel %vm1460_vm3, %v1451_v27, %v1467_v54 }
 0x1b4   : > { %v1394_v3 = vsub.s32 32, %v1393_v9  ;;  %v1398_v51 = vsub.s32 4294967266, %v1393_v9  ;;  %v1470_v17 = vsel %vm1458_vm1, %v1448_v49, %v1451_v27  ;;  %v1395_v4 = vshll.u32 %v3310_v31, %v1393_v9 }
 0x1b5   : > { %v1469_v11 = vsel %vm1459_vm6, %v1466_v20, %v1468_v19  ;;  %v1471_v23 = vsel %vm1461_vm4, %v1457_v37, 1326507024  ;;  %v1542_v47 = vsel %vm1541_vm0, %v1540_v36, 0  ;;  %v1465_v16 = vsel %vm1459_vm6, %v1462_v15, %v1464_v2 }
 0x1b6   : > { %v1396_v44 = vshrl.u32 %v1378_v35, %v1394_v3  ;;  %v1399_v10 = vadd.s32 127, %v1398_v51  ;;  %v1472_v61 = vsel %vm1460_vm3, %v1454_v53, %v1471_v23  ;;  %vm1314_vm7 = vcmp.eq.s32.totalorder %v3306_v5, 0 }
 0x1b7   : > { %v1473_v58 = vsel %vm1459_vm6, %v1470_v17, %v1472_v61  ;;  %v3356_v1 = vmul.u32.u64.low %v3312_v55, %v1469_v11  ;;  %v3357_v25 = vmul.u32.u64.high %v3312_v55, %v1469_v11, %v3356_v1  ;;  %v1544_v56 = vand.u32 31, %v1542_v47 }
 0x1b8   : > { %vm1313_vm8 = vcmp.lt.s32.totalorder %v3306_v5, 2  ;;  %v1397_v31 = vor.u32 %v1396_v44, %v1395_v4  ;;  %v1400_v14 = vshll.u32 %v1399_v10, 23  ;;  %vm1310_vm9 = vweird.f32 %v3058_v60 }
 0x1b9   : > { %v3362_v36 = vmul.u32.u64.low %v3312_v55, %v1473_v58  ;;  %v3363_v35 = vmul.u32.u64.high %v3312_v55, %v1473_v58, %v3362_v36  ;;  %vm1317_vm10 = vcmp.eq.s32.totalorder %v3306_v5, 2  ;;  %v1411_v18 = vsel %vm3336_vm2, 0, %v3332_v8 }
 0x1ba   : > { %v1545_v26 = vsub.s32 32, %v1544_v56  ;;  %v3372_v22 = vshll.u32 %v1538_v24, 8  ;;  %v1401_v30 = vor.u32 4788187, %v1400_v14  ;;  %v1481_v49 = vmul.u32 %v3312_v55, %v1465_v16 }
 0x1bb   : > { %v3375_v62 = vshrl.u32 %v1542_v47, 5  ;;  %v1547_v0 = vshll.u32 %v2363_v39, %v1544_v56  ;;  %v1484_v6 = vadd.s32 1, %v3357_v25  ;;  %v1550_v53 = vshll.u32 %v2364_v43, %v1544_v56 }
 0x1bc   : > { %v1548_v27 = vshrl.u32 %v2364_v43, %v1545_v26  ;;  %v1553_v8 = vshll.u32 %v2365_v48, %v1544_v56  ;;  %v2318_v38 = vpop.eup %2317  ;;  %v1402_v12 = vand.u32 2147483647, %v1401_v30  ;;  %v1404_v59 = vcvt.s32.f32 %v1397_v31 }
 0x1bd   : > { %vm1483_vm12 = vc.u32 %v3363_v35, %v3356_v1  ;;  %v1551_v55 = vshrl.u32 %v2365_v48, %v1545_v26  ;;  %v2320_v24 = vpop.eup %2319  ;;  %v1318_v29 = vxor.u32 2147483648, %v2318_v38  ;;  %v1554_v20 = vshrl.u32 %v2366_v50, %v1545_v26 }
 0x1be   : > { %v1485_v40 = vsel %vm1483_vm12, %v1484_v6, %v3357_v25  ;;  %v1556_v37 = vshll.u32 %v2366_v50, %v1544_v56  ;;  %v1315_v32 = vxor.u32 2147483648, %v2320_v24  ;;  %v1405_v54 = vmul.f32 %v1404_v59, %v1402_v12 }
 0x1bf   : > { %v1486_v9 = vadd.s32 %v1485_v40, %v1481_v49  ;;  %v1559_v15 = vshll.u32 %v2367_v52, %v1544_v56  ;;  %v1319_v2 = vsel %vm1317_vm10, %v1318_v29, %v2320_v24  ;;  %v1549_v19 = vor.u32 %v1548_v27, %v1547_v0 }
 0x1c0   : > { %v1557_v3 = vshrl.u32 %v2367_v52, %v1545_v26  ;;  %v1560_v51 = vshrl.u32 %v2368_v63, %v1545_v26  ;;  %v1316_v17 = vsel %vm1314_vm7, %v2318_v38, %v1315_v32  ;;  %v1406_v4 = vxor.u32 2147483648, %v1405_v54 }
 0x1c1   : > { %v1487_v11 = vadd.s32 536870912, %v1486_v9  ;;  %v1552_v23 = vor.u32 %v1551_v55, %v1550_v53  ;;  %v1320_v47 = vsel %vm1313_vm8, %v1316_v17, %v1319_v2  ;;  %v1415_v44 = vadd.s32 3, %v1411_v18 }
 0x1c2   : > { %v1555_v10 = vor.u32 %v1554_v20, %v1553_v8  ;;  %v1558_v16 = vor.u32 %v1557_v3, %v1556_v37  ;;  %v1321_v61 = vsel %vm1310_vm9, nan, %v1320_v47  ;;  %v1407_v58 = vsel %vm1324_vm15, %v1406_v4, %v1405_v54  ;;  %v3439_v37 = vld [vmem:[%s3779_s1 + $0x2] ss:$0 sm:$0xff] }
 0x1c3   : > { %v1488_v25 = vshrl.u32 %v1487_v11, 30  ;;  %v1561_v56 = vor.u32 %v1560_v51, %v1559_v15  ;;  %2059 = vst.msk [vmem:[%s2707_s24 + $0x40] sm:$0xff] %vm2050_vm11, %v1321_v61  ;;  %v1410_v31 = vsel %vm3336_vm2, %v3098_v34, %v1407_v58  ;;  %v1546_v5 = vshrl.u32 %v2363_v39, %v1545_v26  ;;  %v3465_v11 = vld [vmem:[%s3779_s1 + $0x1] ss:$0 sm:$0xff] }
 0x1c4   : > { %vm1562_vm13 = vcmp.lt.s32.totalorder %v3375_v62, 1  ;;  %vm1564_vm14 = vcmp.lt.s32.totalorder %v3375_v62, 3  ;;  %2321 = vcosq.f32 %v1410_v31  ;;  %vm1565_vm0 = vcmp.lt.s32.totalorder %v3375_v62, 4 }
 0x1c5   : > { %v1489_v60 = vshll.u32 %v1488_v25, 30  ;;  %v1570_v14 = vsel %vm1562_vm13, %v1549_v19, %v1552_v23  ;;  %2323 = vsinq.f32 %v1410_v31  ;;  %v1567_v36 = vsel %vm1565_vm0, %v1555_v10, 2102212464 }
 0x1c6   : > { %v1571_v18 = vsel %vm1565_vm0, %v1558_v16, 920167782  ;;  %v1574_v30 = vsel %vm1562_vm13, %v1552_v23, %v1555_v10  ;;  %vm1563_vm15 = vcmp.lt.s32.totalorder %v3375_v62, 2  ;;  %v1575_v26 = vsel %vm1565_vm0, %v1561_v56, 1326507024 }
 0x1c7   : > { %v3410_v49 = vsub.s32 %v1486_v9, %v1489_v60  ;;  %v1572_v13 = vsel %vm1564_vm14, %v1555_v10, %v1571_v18  ;;  %v1512_v0 = vsub.s32 4, %v1488_v25  ;;  %v1566_v6 = vsel %vm1562_vm13, %v1546_v5, %v1549_v19  ;;  %v319_v9 = vpop.permute.xlu0 %318 }
 0x1c8   : > { %v1573_v27 = vsel %vm1563_vm15, %v1570_v14, %v1572_v13  ;;  %v1576_v53 = vsel %vm1564_vm14, %v1558_v16, %v1575_v26  ;;  %v1568_v38 = vsel %vm1564_vm14, %v1552_v23, %v1567_v36  ;;  %v361_v59 = vadd.f32 %v3304_v33, %v2421_v42 }
 0x1c9   : > { %v1492_v8 = vsub.s32 0, %v3410_v49  ;;  %v1577_v12 = vsel %vm1563_vm15, %v1574_v30, %v1576_v53  ;;  %v3431_v29 = vmul.u32.u64.low %v3372_v22, %v1573_v27  ;;  %v3432_v40 = vmul.u32.u64.high %v3372_v22, %v1573_v27, %v3431_v29 }
 0x1ca   : > { %v3427_v55 = vmul.u32.u64.low %v3372_v22, %v1577_v12  ;;  %v3428_v24 = vmul.u32.u64.high %v3372_v22, %v1577_v12, %v3427_v55  ;;  %v3442_v32 = vadd.f32 %v3439_v37, %v361_v59  ;;  %v1569_v42 = vsel %vm1563_vm15, %v1566_v6, %v1568_v38 }
 0x1cb   : > { %v2176_v20 = vmin.u32 %v1492_v8, %v3410_v49  ;;  %v1416_v33 = vand.u32 3, %v1415_v44  ;;  %vm1428_vm1 = vcmp.lt.s32.totalorder %v3232_v7, 0  ;;  %v1588_v2 = vadd.s32 1, %v3432_v40 }
 0x1cc   : > { %v1513_v15 = vsel %vm1428_vm1, %v1512_v0, %v1488_v25  ;;  %vm1587_vm2 = vc.u32 %v3428_v24, %v3431_v29  ;;  %v1585_v3 = vmul.u32 %v3372_v22, %v1569_v42  ;;  %v1634_v51 = vand.u32 2147483647, %v3442_v32 }
 0x1cd   : > { %v1494_v54 = vclz %v2176_v20  ;;  %v1637_v62 = vand.u32 2139095040, %v3442_v32  ;;  %vm3457_vm3 = vcmp.le.f32.partialorder %v1426_v57, 0.7853982  ;;  %v1589_v4 = vsel %vm1587_vm2, %v1588_v2, %v3432_v40  ;;  %v323_v40 = vpop.permute.xlu1 %322 }
 0x1ce   : > { %v346_v23 = vmul.f32 %v3465_v11, %v319_v9  ;;  %vm1418_vm4 = vcmp.eq.s32.totalorder %v1416_v33, 0  ;;  %v1590_v22 = vadd.s32 %v1589_v4, %v1585_v3  ;;  %vm1421_vm6 = vcmp.eq.s32.totalorder %v1416_v33, 2 }
 0x1cf   : > { %v2177_v19 = vadd.s32 4294967294, %v1494_v54  ;;  %v1638_v47 = vshrl.u32 %v1637_v62, 23  ;;  %v1482_v57 = vadd.s32 %v3356_v1, %v3363_v35  ;;  %v1515_v16 = vsel %vm3457_vm3, 0, %v1513_v15 }
 0x1d0   : > { %v1641_v31 = vand.u32 8388607, %v1634_v51  ;;  %v1591_v60 = vadd.s32 536870912, %v1590_v22  ;;  %v362_v36 = vadd.f32 %v346_v23, %v2419_v41  ;;  %vm1417_vm7 = vcmp.lt.s32.totalorder %v1416_v33, 2 }
 0x1d1   : > { %vm2178_vm5 = vcmp.lt.s32.totalorder %v2177_v19, 0  ;;  %v2322_v44 = vpop.eup %2321  ;;  %v2183_v14 = vadd.s32 4294967169, %v1638_v47  ;;  %vm1414_vm8 = vweird.f32 %v3098_v34  ;;  %v1519_v38 = vadd.s32 3, %v1515_v16 }
 0x1d2   : > { %v1497_v10 = vsel %vm2178_vm5, 0, %v2177_v19  ;;  %v2324_v61 = vpop.eup %2323  ;;  %v1422_v58 = vxor.u32 2147483648, %v2322_v44  ;;  %v3477_v26 = vshrl.u32 %v1591_v60, 30  ;;  %v1642_v12 = vor.u32 8388608, %v1641_v31 }
 0x1d3   : > { %v1498_v25 = vsub.s32 32, %v1497_v10  ;;  %v1502_v56 = vsub.s32 4294967266, %v1497_v10  ;;  %v1419_v5 = vxor.u32 2147483648, %v2324_v61  ;;  %v1499_v1 = vshll.u32 %v3410_v49, %v1497_v10 }
 0x1d4   : > { %v1423_v18 = vsel %vm1421_vm6, %v1422_v58, %v2324_v61  ;;  %v1644_v0 = vadd.s32 1, %v2183_v14  ;;  %v1593_v41 = vshll.u32 %v3477_v26, 30  ;;  %v3484_v55 = vadd.f32 %v3439_v37, %v362_v36 }
 0x1d5   : > { %v1500_v35 = vshrl.u32 %v1482_v57, %v1498_v25  ;;  %v1503_v30 = vadd.s32 127, %v1502_v56  ;;  %v1420_v13 = vsel %vm1418_vm4, %v2322_v44, %v1419_v5  ;;  %v3488_v54 = vand.u32 3, %v1519_v38 }
 0x1d6   : > { %v1424_v6 = vsel %vm1417_vm7, %v1420_v13, %v1423_v18  ;;  %vm1645_vm9 = vcmp.gt.s32.totalorder %v1644_v0, 0  ;;  %v3486_v20 = vsub.s32 %v1590_v22, %v1593_v41  ;;  %v3492_v2 = vmul.f32 %v3465_v11, %v323_v40 }
 0x1d7   : > { %v1501_v27 = vor.u32 %v1500_v35, %v1499_v1  ;;  %v1504_v53 = vshll.u32 %v1503_v30, 23  ;;  %v1425_v8 = vsel %vm1414_vm8, nan, %v1424_v6  ;;  %v1646_v59 = vsel %vm1645_vm9, %v1644_v0, 0 }
 0x1d8   : > { %2060 = vst.msk [vmem:[%s2707_s24 + $0x48] sm:$0xff] %vm2050_vm11, %v1425_v8  ;;  %v1648_v34 = vand.u32 31, %v1646_v59  ;;  %v1596_v9 = vsub.s32 0, %v3486_v20  ;;  %v1586_v3 = vadd.s32 %v3431_v29, %v3428_v24  ;;  %v3496_v62 = vshll.u32 %v1642_v12, 8 }
 0x1d9   : > { %v1505_v49 = vor.u32 4788187, %v1504_v53  ;;  %v1508_v33 = vcvt.s32.f32 %v1501_v27  ;;  %v1741_v4 = vand.u32 2139095040, %v3484_v55  ;;  %v1616_v22 = vsub.s32 4, %v3477_v26 }
 0x1da   : > { %v1649_v15 = vsub.s32 32, %v1648_v34  ;;  %v2180_v23 = vmin.u32 %v1596_v9, %v3486_v20  ;;  %v1651_v47 = vshll.u32 %v2363_v39, %v1648_v34  ;;  %v1647_v29 = vshrl.u32 %v1646_v59, 5 }
 0x1db   : > { %v1506_v42 = vand.u32 2147483647, %v1505_v49  ;;  %v1654_v58 = vshll.u32 %v2364_v43, %v1648_v34  ;;  %v1657_v25 = vshll.u32 %v2365_v48, %v1648_v34  ;;  %v1660_v5 = vshll.u32 %v2366_v50, %v1648_v34 }
 0x1dc   : > { %v1652_v44 = vshrl.u32 %v2364_v43, %v1649_v15  ;;  %v1655_v10 = vshrl.u32 %v2365_v48, %v1649_v15  ;;  %v1658_v16 = vshrl.u32 %v2366_v50, %v1649_v15  ;;  %v1661_v61 = vshrl.u32 %v2367_v52, %v1649_v15 }
 0x1dd   : > { %v1509_v19 = vmul.f32 %v1508_v33, %v1506_v42  ;;  %v1598_v24 = vclz %v2180_v23  ;;  %v1742_v60 = vshrl.u32 %v1741_v4, 23  ;;  %v1663_v30 = vshll.u32 %v2367_v52, %v1648_v34  ;;  %v327_v4 = vpop.permute.xlu0 %326 }
 0x1de   : > { %v1653_v31 = vor.u32 %v1652_v44, %v1651_v47  ;;  %v1656_v18 = vor.u32 %v1655_v10, %v1654_v58  ;;  %v1659_v1 = vor.u32 %v1658_v16, %v1657_v25  ;;  %v1662_v35 = vor.u32 %v1661_v61, %v1660_v5 }
 0x1df   : > { %v1510_v57 = vxor.u32 2147483648, %v1509_v19  ;;  %v2181_v36 = vadd.s32 4294967294, %v1598_v24  ;;  %v1664_v13 = vshrl.u32 %v2368_v63, %v1649_v15  ;;  %vm1532_vm10 = vcmp.lt.s32.totalorder %v3254_v21, 0 }
 0x1e0   : > { %v1650_v0 = vshrl.u32 %v2363_v39, %v1649_v15  ;;  %vm1666_vm13 = vcmp.lt.s32.totalorder %v1647_v29, 1  ;;  %vm1667_vm14 = vcmp.lt.s32.totalorder %v1647_v29, 2  ;;  %vm1669_vm0 = vcmp.lt.s32.totalorder %v1647_v29, 4 }
 0x1e1   : > { %v1511_v56 = vsel %vm1428_vm1, %v1510_v57, %v1509_v19  ;;  %vm2182_vm12 = vcmp.lt.s32.totalorder %v2181_v36, 0  ;;  %v1665_v27 = vor.u32 %v1664_v13, %v1663_v30  ;;  %vm1668_vm15 = vcmp.lt.s32.totalorder %v1647_v29, 3 }
 0x1e2   : > { %v1514_v14 = vsel %vm3457_vm3, %v3232_v7, %v1511_v56  ;;  %v1601_v6 = vsel %vm2182_vm12, 0, %v2181_v36  ;;  %v1671_v8 = vsel %vm1669_vm0, %v1659_v1, 2102212464  ;;  %v1674_v41 = vsel %vm1666_vm13, %v1653_v31, %v1656_v18 }
 0x1e3   : > { %2325 = vcosq.f32 %v1514_v14  ;;  %v1602_v17 = vsub.s32 32, %v1601_v6  ;;  %v1606_v53 = vsub.s32 4294967266, %v1601_v6  ;;  %v1603_v38 = vshll.u32 %v3486_v20, %v1601_v6 }
 0x1e4   : > { %2327 = vsinq.f32 %v1514_v14  ;;  %v1675_v49 = vsel %vm1669_vm0, %v1662_v35, 920167782  ;;  %v1678_v12 = vsel %vm1666_vm13, %v1656_v18, %v1659_v1  ;;  %v1679_v42 = vsel %vm1669_vm0, %v1665_v27, 1326507024 }
 0x1e5   : > { %v1604_v59 = vshrl.u32 %v1586_v3, %v1602_v17  ;;  %v1607_v40 = vadd.s32 127, %v1606_v53  ;;  %v1676_v34 = vsel %vm1668_vm15, %v1659_v1, %v1675_v49  ;;  %v1670_v33 = vsel %vm1666_vm13, %v1650_v0, %v1653_v31 }
 0x1e6   : > { %v1677_v9 = vsel %vm1667_vm14, %v1674_v41, %v1676_v34  ;;  %v1680_v15 = vsel %vm1668_vm15, %v1662_v35, %v1679_v42  ;;  %v2187_v19 = vadd.s32 4294967169, %v1742_v60  ;;  %v1672_v47 = vsel %vm1668_vm15, %v1656_v18, %v1671_v8 }
 0x1e7   : > { %v1605_v23 = vor.u32 %v1604_v59, %v1603_v38  ;;  %v1608_v20 = vshll.u32 %v1607_v40, 23  ;;  %v1681_v44 = vsel %vm1667_vm14, %v1678_v12, %v1680_v15  ;;  %vm3538_vm1 = vcmp.le.f32.partialorder %v1530_v28, 0.7853982 }
 0x1e8   : > { %v3528_v3 = vmul.u32.u64.low %v3496_v62, %v1681_v44  ;;  %v3529_v57 = vmul.u32.u64.high %v3496_v62, %v1681_v44, %v3528_v3  ;;  %v3532_v10 = vmul.u32.u64.low %v3496_v62, %v1677_v9  ;;  %v3533_v16 = vmul.u32.u64.high %v3496_v62, %v1677_v9, %v3532_v10 }
 0x1e9   : > { %v1609_v24 = vor.u32 4788187, %v1608_v20  ;;  %v1748_v58 = vadd.s32 1, %v2187_v19  ;;  %v348_v25 = vmul.f32 %v3465_v11, %v327_v4  ;;  %vm1518_vm2 = vweird.f32 %v3232_v7 }
 0x1ea   : > { %vm1521_vm3 = vcmp.lt.s32.totalorder %v3488_v54, 2  ;;  %v1617_v56 = vsel %vm1532_vm10, %v1616_v22, %v3477_v26  ;;  %v1673_v31 = vsel %vm1667_vm14, %v1670_v33, %v1672_v47  ;;  %v1738_v5 = vand.u32 2147483647, %v3484_v55 }
 0x1eb   : > { %vm1522_vm4 = vcmp.eq.s32.totalorder %v3488_v54, 0  ;;  %v1610_v28 = vand.u32 2147483647, %v1609_v24  ;;  %v1612_v60 = vcvt.s32.f32 %v1605_v23  ;;  %vm1749_vm5 = vcmp.gt.s32.totalorder %v1748_v58, 0 }
 0x1ec   : > { %vm1691_vm6 = vc.u32 %v3529_v57, %v3532_v10  ;;  %v1692_v11 = vadd.s32 1, %v3533_v16  ;;  %v1750_v14 = vsel %vm1749_vm5, %v1748_v58, 0  ;;  %v363_v36 = vadd.f32 %v3492_v2, %v2425_v46 }
 0x1ed   : > { %v1613_v26 = vmul.f32 %v1612_v60, %v1610_v28  ;;  %v1619_v22 = vsel %vm3538_vm1, 0, %v1617_v56  ;;  %v1689_v29 = vmul.u32 %v3496_v62, %v1673_v31  ;;  %v1752_v1 = vand.u32 31, %v1750_v14 }
 0x1ee   : > { %vm1525_vm7 = vcmp.eq.s32.totalorder %v3488_v54, 2  ;;  %v1693_v13 = vsel %vm1691_vm6, %v1692_v11, %v3533_v16  ;;  %v1745_v0 = vand.u32 8388607, %v1738_v5  ;;  %v1623_v53 = vadd.s32 3, %v1619_v22 }
 0x1ef   : > { %v1614_v27 = vxor.u32 2147483648, %v1613_v26  ;;  %v1694_v46 = vadd.s32 %v1693_v13, %v1689_v29  ;;  %v1753_v2 = vsub.s32 32, %v1752_v1  ;;  %v1755_v8 = vshll.u32 %v2363_v39, %v1752_v1 }
 0x1f0   : > { %v2326_v18 = vpop.eup %2325  ;;  %v3565_v62 = vadd.f32 %v3439_v37, %v363_v36  ;;  %v1758_v12 = vshll.u32 %v2364_v43, %v1752_v1  ;;  %v1751_v54 = vshrl.u32 %v1750_v14, 5  ;;  %v1761_v4 = vshll.u32 %v2365_v48, %v1752_v1 }
 0x1f1   : > { %v2328_v35 = vpop.eup %2327  ;;  %v1526_v30 = vxor.u32 2147483648, %v2326_v18  ;;  %v1615_v41 = vsel %vm1532_vm10, %v1614_v27, %v1613_v26  ;;  %v1695_v49 = vadd.s32 536870912, %v1694_v46  ;;  %v1756_v34 = vshrl.u32 %v2364_v43, %v1753_v2 }
 0x1f2   : > { %v1523_v6 = vxor.u32 2147483648, %v2328_v35  ;;  %v1618_v40 = vsel %vm3538_vm1, %v3254_v21, %v1615_v41  ;;  %v1759_v42 = vshrl.u32 %v2365_v48, %v1753_v2  ;;  %v1762_v15 = vshrl.u32 %v2366_v50, %v1753_v2 }
 0x1f3   : > { %v1527_v17 = vsel %vm1525_vm7, %v1526_v30, %v2328_v35  ;;  %2329 = vcosq.f32 %v1618_v40  ;;  %v3581_v9 = vshrl.u32 %v1695_v49, 30  ;;  %v1757_v19 = vor.u32 %v1756_v34, %v1755_v8 }
 0x1f4   : > { %v1524_v38 = vsel %vm1522_vm4, %v2326_v18, %v1523_v6  ;;  %2331 = vsinq.f32 %v1618_v40  ;;  %v1760_v20 = vor.u32 %v1759_v42, %v1758_v12  ;;  %v1764_v47 = vshll.u32 %v2366_v50, %v1752_v1 }
 0x1f5   : > { %v1528_v59 = vsel %vm1521_vm3, %v1524_v38, %v1527_v17  ;;  %v1697_v23 = vshll.u32 %v3581_v9, 30  ;;  %v1765_v7 = vshrl.u32 %v2367_v52, %v1753_v2  ;;  %v1763_v44 = vor.u32 %v1762_v15, %v1761_v4 }
 0x1f6   : > { %v1529_v33 = vsel %vm1518_vm2, nan, %v1528_v59  ;;  %v1767_v3 = vshll.u32 %v2367_v52, %v1752_v1  ;;  %v1768_v16 = vshrl.u32 %v2368_v63, %v1753_v2  ;;  %v1624_v61 = vand.u32 3, %v1623_v53 }
 0x1f7   : > { %2061 = vst.msk [vmem:[%s2707_s24 + $0x50] sm:$0xff] %vm2050_vm11, %v1529_v33  ;;  %v3592_v24 = vsub.s32 %v1694_v46, %v1697_v23  ;;  %v1766_v58 = vor.u32 %v1765_v7, %v1764_v47  ;;  %v364_v56 = vadd.f32 %v348_v25, %v2423_v45  ;;  %v1746_v31 = vor.u32 8388608, %v1745_v0 }
 0x1f8   : > { %v1769_v28 = vor.u32 %v1768_v16, %v1767_v3  ;;  %vm1770_vm8 = vcmp.lt.s32.totalorder %v1751_v54, 1  ;;  %v1845_v60 = vand.u32 2139095040, %v3565_v62  ;;  %vm1772_vm9 = vcmp.lt.s32.totalorder %v1751_v54, 3 }
 0x1f9   : > { %v1700_v11 = vsub.s32 0, %v3592_v24  ;;  %vm1773_vm10 = vcmp.lt.s32.totalorder %v1751_v54, 4  ;;  %v1778_v14 = vsel %vm1770_vm8, %v1757_v19, %v1760_v20  ;;  %v1754_v36 = vshrl.u32 %v2363_v39, %v1753_v2 }
 0x1fa   : > { %v1775_v18 = vsel %vm1773_vm10, %v1763_v44, 2102212464  ;;  %v1779_v26 = vsel %vm1773_vm10, %v1766_v58, 920167782  ;;  %v1783_v22 = vsel %vm1773_vm10, %v1769_v28, 1326507024  ;;  %v1782_v25 = vsel %vm1770_vm8, %v1760_v20, %v1763_v44 }
 0x1fb   : > { %v2184_v29 = vmin.u32 %v1700_v11, %v3592_v24  ;;  %vm1771_vm12 = vcmp.lt.s32.totalorder %v1751_v54, 2  ;;  %v1780_v45 = vsel %vm1772_vm9, %v1763_v44, %v1779_v26  ;;  %vm1625_vm13 = vcmp.lt.s32.totalorder %v1624_v61, 2 }
 0x1fc   : > { %v1781_v1 = vsel %vm1771_vm12, %v1778_v14, %v1780_v45  ;;  %v1784_v35 = vsel %vm1772_vm9, %v1766_v58, %v1783_v22  ;;  %v1786_v30 = vshll.u32 %v1746_v31, 8  ;;  %vm1622_vm14 = vweird.f32 %v3254_v21 }
 0x1fd   : > { %vm1626_vm0 = vcmp.eq.s32.totalorder %v1624_v61, 0  ;;  %vm1636_vm15 = vcmp.lt.s32.totalorder %v3442_v32, 0  ;;  %v1702_v13 = vclz %v2184_v29  ;;  %v1774_v0 = vsel %vm1770_vm8, %v1754_v36, %v1757_v19 }
 0x1fe   : > { %v1776_v6 = vsel %vm1772_vm9, %v1760_v20, %v1775_v18  ;;  %v1785_v27 = vsel %vm1771_vm12, %v1782_v25, %v1784_v35  ;;  %v3609_v46 = vmul.u32.u64.low %v1786_v30, %v1781_v1  ;;  %v3610_v2 = vmul.u32.u64.high %v1786_v30, %v1781_v1, %v3609_v46 }
 0x1ff   : > { %v1846_v17 = vshrl.u32 %v1845_v60, 23  ;;  %vm1629_vm1 = vcmp.eq.s32.totalorder %v1624_v61, 2  ;;  %v2185_v53 = vadd.s32 4294967294, %v1702_v13  ;;  %v1690_v49 = vadd.s32 %v3532_v10, %v3529_v57 }
 0x200   : > { %v3613_v8 = vmul.u32.u64.low %v1786_v30, %v1785_v27  ;;  %v3614_v38 = vmul.u32.u64.high %v1786_v30, %v1785_v27, %v3613_v8  ;;  %v2330_v41 = vpop.eup %2329  ;;  %v1777_v12 = vsel %vm1771_vm12, %v1774_v0, %v1776_v6  ;;  %v3620_v40 = vadd.f32 %v3439_v37, %v364_v56 }
 0x201   : > { %v2191_v59 = vadd.s32 4294967169, %v1846_v17  ;;  %v2332_v34 = vpop.eup %2331  ;;  %v1630_v42 = vxor.u32 2147483648, %v2330_v41  ;;  %vm2186_vm2 = vcmp.lt.s32.totalorder %v2185_v53, 0  ;;  %v1720_v33 = vsub.s32 4, %v3581_v9 }
 0x202   : > { %v1842_v15 = vand.u32 2147483647, %v3565_v62  ;;  %v1627_v19 = vxor.u32 2147483648, %v2332_v34  ;;  %v1705_v4 = vsel %vm2186_vm2, 0, %v2185_v53  ;;  %v1796_v23 = vadd.s32 1, %v3610_v2 }
 0x203   : > { %v1852_v20 = vadd.s32 1, %v2191_v59  ;;  %v1631_v57 = vsel %vm1629_vm1, %v1630_v42, %v2332_v34  ;;  %v1706_v10 = vsub.s32 32, %v1705_v4  ;;  %v1710_v54 = vsub.s32 4294967266, %v1705_v4 }
 0x204   : > { %v1793_v47 = vmul.u32 %v1786_v30, %v1777_v12  ;;  %v1628_v37 = vsel %vm1626_vm0, %v2330_v41, %v1627_v19  ;;  %v1707_v7 = vshll.u32 %v3592_v24, %v1705_v4  ;;  %vm1795_vm3 = vc.u32 %v3614_v38, %v3609_v46 }
 0x205   : > { %vm1853_vm4 = vcmp.gt.s32.totalorder %v1852_v20, 0  ;;  %v1632_v44 = vsel %vm1625_vm13, %v1628_v37, %v1631_v57  ;;  %v1708_v3 = vshrl.u32 %v1690_v49, %v1706_v10  ;;  %v1711_v16 = vadd.s32 127, %v1710_v54 }
 0x206   : > { %v1797_v58 = vsel %vm1795_vm3, %v1796_v23, %v3610_v2  ;;  %v1633_v56 = vsel %vm1622_vm14, nan, %v1632_v44  ;;  %v1721_v31 = vsel %vm1636_vm15, %v1720_v33, %v3581_v9  ;;  %v1854_v60 = vsel %vm1853_vm4, %v1852_v20, 0 }
 0x207   : > { %v1798_v28 = vadd.s32 %v1797_v58, %v1793_v47  ;;  %2062 = vst.msk [vmem:[%s2707_s24 + $0x58] sm:$0xff] %vm2050_vm11, %v1633_v56  ;;  %v1709_v24 = vor.u32 %v1708_v3, %v1707_v7  ;;  %v1712_v11 = vshll.u32 %v1711_v16, 23  ;;  %v1856_v14 = vand.u32 31, %v1854_v60 }
 0x208   : > { %vm3641_vm5 = vcmp.le.f32.partialorder %v1634_v51, 0.7853982  ;;  %v1849_v29 = vand.u32 8388607, %v1842_v15  ;;  %v1949_v45 = vand.u32 2139095040, %v3620_v40  ;;  %v1855_v2 = vshrl.u32 %v1854_v60, 5 }
 0x209   : > { %v1799_v36 = vadd.s32 536870912, %v1798_v28  ;;  %v1713_v21 = vor.u32 4788187, %v1712_v11  ;;  %v1723_v18 = vsel %vm3641_vm5, 0, %v1721_v31  ;;  %v1857_v26 = vsub.s32 32, %v1856_v14 }
 0x20a   : > { %v1716_v9 = vcvt.s32.f32 %v1709_v24  ;;  %v1859_v51 = vshll.u32 %v2363_v39, %v1856_v14  ;;  %v1862_v13 = vshll.u32 %v2364_v43, %v1856_v14  ;;  %v1865_v17 = vshll.u32 %v2365_v48, %v1856_v14 }
 0x20b   : > { %v3647_v22 = vshrl.u32 %v1799_v36, 30  ;;  %v1714_v25 = vand.u32 2147483647, %v1713_v21  ;;  %v1860_v1 = vshrl.u32 %v2364_v43, %v1857_v26  ;;  %v1863_v35 = vshrl.u32 %v2365_v48, %v1857_v26 }
 0x20c   : > { %v1866_v0 = vshrl.u32 %v2366_v50, %v1857_v26  ;;  %v1869_v6 = vshrl.u32 %v2367_v52, %v1857_v26  ;;  %v1868_v53 = vshll.u32 %v2366_v50, %v1856_v14  ;;  %v1872_v42 = vshrl.u32 %v2368_v63, %v1857_v26 }
 0x20d   : > { %v1801_v30 = vshll.u32 %v3647_v22, 30  ;;  %v1717_v27 = vmul.f32 %v1716_v9, %v1714_v25  ;;  %v1861_v41 = vor.u32 %v1860_v1, %v1859_v51  ;;  %v1864_v49 = vor.u32 %v1863_v35, %v1862_v13 }
 0x20e   : > { %v1867_v59 = vor.u32 %v1866_v0, %v1865_v17  ;;  %v1870_v34 = vor.u32 %v1869_v6, %v1868_v53  ;;  %v1727_v33 = vadd.s32 3, %v1723_v18  ;;  %v1850_v4 = vor.u32 8388608, %v1849_v29 }
 0x20f   : > { %v3661_v8 = vsub.s32 %v1798_v28, %v1801_v30  ;;  %v1718_v12 = vxor.u32 2147483648, %v1717_v27  ;;  %v1871_v23 = vshll.u32 %v2367_v52, %v1856_v14  ;;  %v1858_v57 = vshrl.u32 %v2363_v39, %v1857_v26 }
 0x210   : > { %vm1874_vm6 = vcmp.lt.s32.totalorder %v1855_v2, 1  ;;  %v1950_v10 = vshrl.u32 %v1949_v45, 23  ;;  %vm1877_vm7 = vcmp.lt.s32.totalorder %v1855_v2, 4  ;;  %vm1876_vm8 = vcmp.lt.s32.totalorder %v1855_v2, 3 }
 0x211   : > { %v1804_v19 = vsub.s32 0, %v3661_v8  ;;  %v1719_v20 = vsel %vm1636_vm15, %v1718_v12, %v1717_v27  ;;  %v1873_v37 = vor.u32 %v1872_v42, %v1871_v23  ;;  %v1879_v7 = vsel %vm1877_vm7, %v1867_v59, 2102212464 }
 0x212   : > { %v1722_v54 = vsel %vm3641_vm5, %v3442_v32, %v1719_v20  ;;  %v1882_v44 = vsel %vm1874_vm6, %v1861_v41, %v1864_v49  ;;  %v1883_v3 = vsel %vm1877_vm7, %v1870_v34, 920167782  ;;  %v1890_v58 = vshll.u32 %v1850_v4, 8 }
 0x213   : > { %v2188_v47 = vmin.u32 %v1804_v19, %v3661_v8  ;;  %2333 = vcosq.f32 %v1722_v54  ;;  %vm1875_vm9 = vcmp.lt.s32.totalorder %v1855_v2, 2  ;;  %v1878_v56 = vsel %vm1874_vm6, %v1858_v57, %v1861_v41 }
 0x214   : > { %2335 = vsinq.f32 %v1722_v54  ;;  %v1884_v31 = vsel %vm1876_vm8, %v1867_v59, %v1883_v3  ;;  %v1886_v28 = vsel %vm1874_vm6, %v1864_v49, %v1867_v59  ;;  %v1880_v24 = vsel %vm1876_vm8, %v1864_v49, %v1879_v7 }
 0x215   : > { %v1806_v16 = vclz %v2188_v47  ;;  %v1885_v11 = vsel %vm1875_vm9, %v1882_v44, %v1884_v31  ;;  %v1887_v14 = vsel %vm1877_vm7, %v1873_v37, 1326507024  ;;  %v2195_v18 = vadd.s32 4294967169, %v1950_v10 }
 0x216   : > { %v1888_v61 = vsel %vm1876_vm8, %v1870_v34, %v1887_v14  ;;  %v3680_v36 = vmul.u32.u64.low %v1890_v58, %v1885_v11  ;;  %v3681_v21 = vmul.u32.u64.high %v1890_v58, %v1885_v11, %v3680_v36  ;;  %v1794_v51 = vadd.s32 %v3609_v46, %v3614_v38 }
 0x217   : > { %v2189_v60 = vadd.s32 4294967294, %v1806_v16  ;;  %v1889_v26 = vsel %vm1875_vm9, %v1886_v28, %v1888_v61  ;;  %v1956_v25 = vadd.s32 1, %v2195_v18  ;;  %v1881_v30 = vsel %vm1875_vm9, %v1878_v56, %v1880_v24 }
 0x218   : > { %v3685_v29 = vmul.u32.u64.low %v1890_v58, %v1889_v26  ;;  %v3686_v45 = vmul.u32.u64.high %v1890_v58, %v1889_v26, %v3685_v29  ;;  %v1728_v13 = vand.u32 3, %v1727_v33  ;;  %v1900_v0 = vadd.s32 1, %v3681_v21 }
 0x219   : > { %vm2190_vm10 = vcmp.lt.s32.totalorder %v2189_v60, 0  ;;  %v1946_v6 = vand.u32 2147483647, %v3620_v40  ;;  %vm1957_vm12 = vcmp.gt.s32.totalorder %v1956_v25, 0  ;;  %vm1726_vm13 = vweird.f32 %v3442_v32 }
 0x21a   : > { %v1809_v9 = vsel %vm2190_vm10, 0, %v2189_v60  ;;  %v1958_v41 = vsel %vm1957_vm12, %v1956_v25, 0  ;;  %v1897_v49 = vmul.u32 %v1890_v58, %v1881_v30  ;;  %vm1899_vm14 = vc.u32 %v3686_v45, %v3680_v36 }
 0x21b   : > { %v1810_v1 = vsub.s32 32, %v1809_v9  ;;  %v1814_v35 = vsub.s32 4294967266, %v1809_v9  ;;  %v1811_v27 = vshll.u32 %v3661_v8, %v1809_v9  ;;  %v1960_v46 = vand.u32 31, %v1958_v41 }
 0x21c   : > { %vm1740_vm0 = vcmp.lt.s32.totalorder %v3484_v55, 0  ;;  %v1901_v12 = vsel %vm1899_vm14, %v1900_v0, %v3681_v21  ;;  %vm1729_vm15 = vcmp.lt.s32.totalorder %v1728_v13, 2  ;;  %vm1730_vm1 = vcmp.eq.s32.totalorder %v1728_v13, 0 }
 0x21d   : > { %v1812_v17 = vshrl.u32 %v1794_v51, %v1810_v1  ;;  %v1815_v53 = vadd.s32 127, %v1814_v35  ;;  %v1902_v59 = vadd.s32 %v1901_v12, %v1897_v49  ;;  %v1961_v8 = vsub.s32 32, %v1960_v46 }
 0x21e   : > { %vm1733_vm2 = vcmp.eq.s32.totalorder %v1728_v13, 2  ;;  %vm3701_vm3 = vcmp.le.f32.partialorder %v1738_v5, 0.7853982  ;;  %v1824_v19 = vsub.s32 4, %v3647_v22  ;;  %v1953_v4 = vand.u32 8388607, %v1946_v6 }
 0x21f   : > { %v1813_v38 = vor.u32 %v1812_v17, %v1811_v27  ;;  %v1816_v2 = vshll.u32 %v1815_v53, 23  ;;  %v1903_v57 = vadd.s32 536870912, %v1902_v59  ;;  %v3708_v10 = vshrl.u32 %v1958_v41, 5 }
 0x220   : > { %v2334_v34 = vpop.eup %2333  ;;  %v1963_v54 = vshll.u32 %v2363_v39, %v1960_v46  ;;  %v1966_v5 = vshll.u32 %v2364_v43, %v1960_v46  ;;  %v1964_v16 = vshrl.u32 %v2364_v43, %v1961_v8  ;;  %v1970_v58 = vshrl.u32 %v2366_v50, %v1961_v8 }
 0x221   : > { %v1817_v33 = vor.u32 4788187, %v1816_v2  ;;  %v2336_v23 = vpop.eup %2335  ;;  %v1734_v20 = vxor.u32 2147483648, %v2334_v34  ;;  %v1820_v7 = vcvt.s32.f32 %v1813_v38  ;;  %v3712_v3 = vshrl.u32 %v1903_v57, 30 }
 0x222   : > { %v1731_v47 = vxor.u32 2147483648, %v2336_v23  ;;  %v1967_v28 = vshrl.u32 %v2365_v48, %v1961_v8  ;;  %v1973_v60 = vshrl.u32 %v2367_v52, %v1961_v8  ;;  %v1969_v14 = vshll.u32 %v2365_v48, %v1960_v46 }
 0x223   : > { %v1818_v37 = vand.u32 2147483647, %v1817_v33  ;;  %v1735_v44 = vsel %vm1733_vm2, %v1734_v20, %v2336_v23  ;;  %v1905_v11 = vshll.u32 %v3712_v3, 30  ;;  %v1972_v61 = vshll.u32 %v2366_v50, %v1960_v46 }
 0x224   : > { %v1732_v56 = vsel %vm1730_vm1, %v2334_v34, %v1731_v47  ;;  %v1975_v18 = vshll.u32 %v2367_v52, %v1960_v46  ;;  %v1976_v26 = vshrl.u32 %v2368_v63, %v1961_v8  ;;  %v1825_v9 = vsel %vm1740_vm0, %v1824_v19, %v3647_v22 }
 0x225   : > { %v1821_v31 = vmul.f32 %v1820_v7, %v1818_v37  ;;  %v1736_v24 = vsel %vm1729_vm15, %v1732_v56, %v1735_v44  ;;  %v1906_v29 = vsub.s32 %v1902_v59, %v1905_v11  ;;  %v1965_v25 = vor.u32 %v1964_v16, %v1963_v54 }
 0x226   : > { %v1737_v43 = vsel %vm1726_vm13, nan, %v1736_v24  ;;  %v1971_v51 = vor.u32 %v1970_v58, %v1969_v14  ;;  %v1968_v50 = vor.u32 %v1967_v28, %v1966_v5  ;;  %v1974_v32 = vor.u32 %v1973_v60, %v1972_v61 }
 0x227   : > { %v1822_v21 = vxor.u32 2147483648, %v1821_v31  ;;  %2063 = vst.msk [vmem:[%s2707_s24 + $0x60] sm:$0xff] %vm2050_vm11, %v1737_v43  ;;  %v1977_v1 = vor.u32 %v1976_v26, %v1975_v18  ;;  %v1908_v63 = vsub.s32 0, %v1906_v29  ;;  %v1954_v35 = vor.u32 8388608, %v1953_v4 }
 0x228   : > { %v1827_v30 = vsel %vm3701_vm3, 0, %v1825_v9  ;;  %v1962_v22 = vshrl.u32 %v2363_v39, %v1961_v8  ;;  %vm1981_vm4 = vcmp.lt.s32.totalorder %v3708_v10, 4  ;;  %vm1978_vm5 = vcmp.lt.s32.totalorder %v3708_v10, 1 }
 0x229   : > { %v1823_v48 = vsel %vm1740_vm0, %v1822_v21, %v1821_v31  ;;  %v2192_v13 = vmin.u32 %v1908_v63, %v1906_v29  ;;  %v1983_v0 = vsel %vm1981_vm4, %v1971_v51, 2102212464  ;;  %v1986_v27 = vsel %vm1978_vm5, %v1965_v25, %v1968_v50 }
 0x22a   : > { %v1826_v52 = vsel %vm3701_vm3, %v3484_v55, %v1823_v48  ;;  %v1987_v17 = vsel %vm1981_vm4, %v1974_v32, 920167782  ;;  %v1990_v53 = vsel %vm1978_vm5, %v1968_v50, %v1971_v51  ;;  %v1991_v41 = vsel %vm1981_vm4, %v1977_v1, 1326507024 }
 0x22b   : > { %2337 = vcosq.f32 %v1826_v52  ;;  %v1831_v49 = vadd.s32 3, %v1827_v30  ;;  %v1910_v46 = vclz %v2192_v13  ;;  %vm1980_vm6 = vcmp.lt.s32.totalorder %v3708_v10, 3 }
 0x22c   : > { %2339 = vsinq.f32 %v1826_v52  ;;  %v1994_v38 = vshll.u32 %v1954_v35, 8  ;;  %vm1979_vm7 = vcmp.lt.s32.totalorder %v3708_v10, 2  ;;  %v1982_v2 = vsel %vm1978_vm5, %v1962_v22, %v1965_v25 }
 0x22d   : > { %v1988_v39 = vsel %vm1980_vm6, %v1971_v51, %v1987_v17  ;;  %v1992_v12 = vsel %vm1980_vm6, %v1974_v32, %v1991_v41  ;;  %v2193_v59 = vadd.s32 4294967294, %v1910_v46  ;;  %v1984_v8 = vsel %vm1980_vm6, %v1968_v50, %v1983_v0 }
 0x22e   : > { %v1989_v34 = vsel %vm1979_vm7, %v1986_v27, %v1988_v39  ;;  %v1993_v42 = vsel %vm1979_vm7, %v1990_v53, %v1992_v12  ;;  %v1985_v57 = vsel %vm1979_vm7, %v1982_v2, %v1984_v8  ;;  %v1898_v54 = vadd.s32 %v3680_v36, %v3686_v45 }
 0x22f   : > { %v3744_v33 = vmul.u32.u64.low %v1994_v38, %v1993_v42  ;;  %v3745_v19 = vmul.u32.u64.high %v1994_v38, %v1993_v42, %v3744_v33  ;;  %v3747_v4 = vmul.u32.u64.low %v1994_v38, %v1989_v34  ;;  %v3748_v23 = vmul.u32.u64.high %v1994_v38, %v1989_v34, %v3747_v4 }
 0x230   : > { %vm2194_vm8 = vcmp.lt.s32.totalorder %v2193_v59, 0  ;;  %v1832_v37 = vand.u32 3, %v1831_v49  ;;  %v2001_v58 = vmul.u32 %v1994_v38, %v1985_v57  ;;  %vm1830_vm14 = vweird.f32 %v3484_v55 }
 0x231   : > { %v1913_v20 = vsel %vm2194_vm8, 0, %v2193_v59  ;;  %vm2003_vm9 = vc.u32 %v3745_v19, %v3747_v4  ;;  %v2004_v7 = vadd.s32 1, %v3748_v23  ;;  %vm1844_vm0 = vcmp.lt.s32.totalorder %v3565_v62, 0 }
 0x232   : > { %v1914_v10 = vsub.s32 32, %v1913_v20  ;;  %v1918_v47 = vsub.s32 4294967266, %v1913_v20  ;;  %v1915_v5 = vshll.u32 %v1906_v29, %v1913_v20  ;;  %vm1837_vm10 = vcmp.eq.s32.totalorder %v1832_v37, 2 }
 0x233   : > { %v2005_v56 = vsel %vm2003_vm9, %v2004_v7, %v3748_v23  ;;  %vm1833_vm12 = vcmp.lt.s32.totalorder %v1832_v37, 2  ;;  %vm1834_vm13 = vcmp.eq.s32.totalorder %v1832_v37, 0  ;;  %v1928_v1 = vsub.s32 4, %v3712_v3 }
 0x234   : > { %v1916_v44 = vshrl.u32 %v1898_v54, %v1914_v10  ;;  %v1919_v16 = vadd.s32 127, %v1918_v47  ;;  %v2006_v24 = vadd.s32 %v2005_v56, %v2001_v58  ;;  %vm1843_vm15 = vcmp.le.f32.partialorder %v1842_v15, 0.7853982 }
 0x235   : > { %v1929_v30 = vsel %vm1844_vm0, %v1928_v1, %v3712_v3  ;;  %v2002_v53 = vadd.s32 %v3747_v4, %v3745_v19  ;;  %vm1934_vm5 = vweird.f32 %v3565_v62  ;;  %vm1948_vm6 = vcmp.lt.s32.totalorder %v3620_v40, 0 }
 0x236   : > { %v1917_v28 = vor.u32 %v1916_v44, %v1915_v5  ;;  %v1920_v60 = vshll.u32 %v1919_v16, 23  ;;  %v2007_v61 = vadd.s32 536870912, %v2006_v24  ;;  %v1931_v13 = vsel %vm1843_vm15, 0, %v1929_v30 }
 0x237   : > { %v1935_v27 = vadd.s32 3, %v1931_v13  ;;  %vm1947_vm7 = vcmp.le.f32.partialorder %v1946_v6, 0.7853982 }
 0x238   : > { %v2338_v31 = vpop.eup %2337  ;;  %v1921_v45 = vor.u32 4788187, %v1920_v60  ;;  %v1924_v26 = vcvt.s32.f32 %v1917_v28  ;;  %v2008_v9 = vshrl.u32 %v2007_v61, 30 }
 0x239   : > { %v2340_v11 = vpop.eup %2339  ;;  %v1838_v14 = vxor.u32 2147483648, %v2338_v31  ;;  %v1936_v2 = vand.u32 3, %v1935_v27 }
 0x23a   : > { %v1835_v36 = vxor.u32 2147483648, %v2340_v11  ;;  %v1922_v18 = vand.u32 2147483647, %v1921_v45  ;;  %v2009_v48 = vshll.u32 %v2008_v9, 30  ;;  %v2032_v47 = vsub.s32 4, %v2008_v9 }
 0x23b   : > { %v1839_v43 = vsel %vm1837_vm10, %v1838_v14, %v2340_v11  ;;  %vm1941_vm2 = vcmp.eq.s32.totalorder %v1936_v2, 2  ;;  %vm1938_vm3 = vcmp.eq.s32.totalorder %v1936_v2, 0  ;;  %vm1937_vm4 = vcmp.lt.s32.totalorder %v1936_v2, 2 }
 0x23c   : > { %v1836_v21 = vsel %vm1834_vm13, %v2338_v31, %v1835_v36  ;;  %v1925_v51 = vmul.f32 %v1924_v26, %v1922_v18  ;;  %v2010_v32 = vsub.s32 %v2006_v24, %v2009_v48  ;;  %v2033_v5 = vsel %vm1948_vm6, %v2032_v47, %v2008_v9 }
 0x23d   : > { %v1840_v29 = vsel %vm1833_vm12, %v1836_v21, %v1839_v43  ;;  %vm2038_vm12 = vweird.f32 %v3620_v40 }
 0x23e   : > { %v1841_v25 = vsel %vm1830_vm14, nan, %v1840_v29  ;;  %v1926_v50 = vxor.u32 2147483648, %v1925_v51  ;;  %v2012_v63 = vsub.s32 0, %v2010_v32 }
 0x23f   : > { %2064 = vst.msk [vmem:[%s2707_s24 + $0x68] sm:$0xff] %vm2050_vm11, %v1841_v25 }
 0x240   : > { %v1927_v52 = vsel %vm1844_vm0, %v1926_v50, %v1925_v51  ;;  %v2196_v55 = vmin.u32 %v2012_v63, %v2010_v32 }
 0x241   : > { %v1930_v35 = vsel %vm1843_vm15, %v3565_v62, %v1927_v52  ;;  %v2035_v62 = vsel %vm1947_vm7, 0, %v2033_v5 }
 0x242   : > { %2341 = vcosq.f32 %v1930_v35  ;;  %v2014_v22 = vclz %v2196_v55  ;;  %v2039_v44 = vadd.s32 3, %v2035_v62 }
 0x243   : > { %2343 = vsinq.f32 %v1930_v35 }
 0x244   : > { %v2197_v0 = vadd.s32 4294967294, %v2014_v22  ;;  %v2040_v16 = vand.u32 3, %v2039_v44 }
 0x246   : > { %vm2198_vm1 = vcmp.lt.s32.totalorder %v2197_v0, 0  ;;  %vm2045_vm8 = vcmp.eq.s32.totalorder %v2040_v16, 2  ;;  %vm2042_vm9 = vcmp.eq.s32.totalorder %v2040_v16, 0  ;;  %vm2041_vm10 = vcmp.lt.s32.totalorder %v2040_v16, 2 }
 0x247   : > { %v2017_v17 = vsel %vm2198_vm1, 0, %v2197_v0 }
 0x248   : > { %v2018_v41 = vsub.s32 32, %v2017_v17  ;;  %v2022_v49 = vsub.s32 4294967266, %v2017_v17  ;;  %v2019_v15 = vshll.u32 %v2010_v32, %v2017_v17 }
 0x24a   : > { %v2020_v46 = vshrl.u32 %v2002_v53, %v2018_v41  ;;  %v2023_v38 = vadd.s32 127, %v2022_v49 }
 0x24c   : > { %v2021_v39 = vor.u32 %v2020_v46, %v2019_v15  ;;  %v2024_v12 = vshll.u32 %v2023_v38, 23 }
 0x24e   : > { %v2025_v34 = vor.u32 4788187, %v2024_v12  ;;  %v2028_v20 = vcvt.s32.f32 %v2021_v39 }
 0x24f   : > { %v2342_v59 = vpop.eup %2341 }
 0x250   : > { %v2344_v3 = vpop.eup %2343  ;;  %v1942_v8 = vxor.u32 2147483648, %v2342_v59  ;;  %v2026_v23 = vand.u32 2147483647, %v2025_v34 }
 0x251   : > { %v1939_v42 = vxor.u32 2147483648, %v2344_v3 }
 0x252   : > { %v1943_v33 = vsel %vm1941_vm2, %v1942_v8, %v2344_v3  ;;  %v2029_v57 = vmul.f32 %v2028_v20, %v2026_v23 }
 0x253   : > { %v1940_v19 = vsel %vm1938_vm3, %v2342_v59, %v1939_v42 }
 0x254   : > { %v1944_v4 = vsel %vm1937_vm4, %v1940_v19, %v1943_v33  ;;  %v2030_v10 = vxor.u32 2147483648, %v2029_v57 }
 0x255   : > { %v1945_v54 = vsel %vm1934_vm5, nan, %v1944_v4 }
 0x256   : > { %2065 = vst.msk [vmem:[%s2707_s24 + $0x70] sm:$0xff] %vm2050_vm11, %v1945_v54  ;;  %v2031_v37 = vsel %vm1948_vm6, %v2030_v10, %v2029_v57 }
 0x257   : > { %v2034_v7 = vsel %vm1947_vm7, %v3620_v40, %v2031_v37 }
 0x258   : > { %2345 = vcosq.f32 %v2034_v7 }
 0x259   : > { %2347 = vsinq.f32 %v2034_v7 }
 0x265   : > { %v2346_v58 = vpop.eup %2345 }
 0x266   : > { %v2348_v56 = vpop.eup %2347  ;;  %v2046_v31 = vxor.u32 2147483648, %v2346_v58 }
 0x267   : > { %v2043_v28 = vxor.u32 2147483648, %v2348_v56 }
 0x268   : > { %v2047_v60 = vsel %vm2045_vm8, %v2046_v31, %v2348_v56 }
 0x269   : > { %v2044_v24 = vsel %vm2042_vm9, %v2346_v58, %v2043_v28 }
 0x26a   : > { %v2048_v6 = vsel %vm2041_vm10, %v2044_v24, %v2047_v60 }
 0x26b   : > { %v2049_v11 = vsel %vm2038_vm12, nan, %v2048_v6 }
 0x26c   : > { %2066 = vst.msk [vmem:[%s2707_s24 + $0x78] sm:$0xff] %vm2050_vm11, %v2049_v11 }
 0x26d PF: > { %s12_s9 = sadd.s32 1, %s2359_s9  }
 0x26e   : > { %p9_p4 = scmp.ge.s32.totalorder %s12_s9, 4  }
 0x270   :  { %11 = sbr.rel (!%p9_p4) target bundleno = 1 (0x1), region = 58 }

</bundles_post_ra>
